<compile_context>
chip_gen: v5e
topology: v5e:2x2
jax: 0.10.0
libtpu: 0.0.40
codegen_flags: <defaults>
</compile_context>

<pallas_src>
import functools
import math

import jax
import jax.numpy as jnp
from jax.experimental import pallas as pl
from jax.experimental.pallas import tpu as pltpu

_PROJ_BLOCK_BYTES = 4 << 20    # per-block budget for the stage-1 weight tile
_STATE_BLOCK_BYTES = 8 << 20   # per-block budget for a stage-3 C tile


# ---------------------------------------------------------------------------
# Tile pickers.
# ---------------------------------------------------------------------------
def _largest_aligned_divisor(dim, align, cap):
    """Largest multiple of `align` that divides `dim` and is <= cap (or None)."""
    best = None
    t = align
    limit = min(dim, cap)
    while t <= limit:
        if dim % t == 0:
            best = t
        t += align
    return best


def _pick_proj_tiles(k_dim, n_dim, budget_bytes=_PROJ_BLOCK_BYTES):
    """(tk, tn) tiles for the (k_dim, n_dim) fused weight matmul."""
    if k_dim * n_dim * 4 <= budget_bytes:
        return k_dim, n_dim
    tn = _largest_aligned_divisor(n_dim, 128, max(128, budget_bytes // (4 * k_dim)))
    if tn is not None:
        return k_dim, tn
    tn = _largest_aligned_divisor(n_dim, 128, n_dim) or n_dim
    tk = _largest_aligned_divisor(k_dim, 128, max(128, budget_bytes // (4 * tn))) or k_dim
    return tk, tn


def _pick_state_tiles(batch, hidden, row_tile, batch_tile,
                      block_bytes=_STATE_BLOCK_BYTES):
    """(bt, tr) so a (bt, tr, hidden) f32 C block is ~block_bytes."""
    row_bytes = hidden * 4
    if row_tile is not None:
        tr = int(row_tile)
    elif hidden * row_bytes <= block_bytes:
        tr = hidden
    else:
        # TODO(synk): hidden with no multiple-of-8 divisor and H*H*4 >> 8MiB
        # (e.g. a huge prime H) falls back to full rows and may exceed VMEM.
        tr = _largest_aligned_divisor(hidden, 8, block_bytes // row_bytes) or hidden
    if batch_tile is not None:
        bt = int(batch_tile)
    else:
        bt = max(1, min(batch, block_bytes // max(tr * row_bytes, 1)))
        while batch % bt:
            bt -= 1
    return bt, tr


# ---------------------------------------------------------------------------
# Stage 1: fused gate projection  gates = x @ W6 + b6,   tiled over (N, K).
# ---------------------------------------------------------------------------
def _gate_proj_kernel(x_ref, w_ref, b_ref, z_ref, acc_ref):
    k = pl.program_id(1)

    @pl.when(k == 0)
    def _():
        acc_ref[...] = jnp.zeros_like(acc_ref)

    acc_ref[...] += jnp.dot(x_ref[...], w_ref[...],
                            preferred_element_type=jnp.float32)

    @pl.when(k == pl.num_programs(1) - 1)
    def _():
        z_ref[...] = acc_ref[...] + b_ref[...]


# ---------------------------------------------------------------------------
# Stage 2: per-batch gate math (computed exactly once per cell call).
# Outputs:
#   rowvecs_t (B, 4, H): [f, i'*v, alpha, beta]   (transposed to (B,H,4) later)
#   colvecs   (B, 2, H): [k/sqrt(H), q]
#   n_t, m_t  (B, H)
# ---------------------------------------------------------------------------
def _gate_math_kernel(z_ref, n_ref, m_ref, rowvecs_ref, colvecs_ref, n_out, m_out):
    hidden = z_ref.shape[-1]
    inv_sqrt_h = 1.0 / math.sqrt(hidden)

    z = z_ref[...]                      # (B, 6, H): [i, f, o, q, k, v]
    i_til = z[:, 0, :]
    f_til = z[:, 1, :]
    o_til = z[:, 2, :]
    q_t = z[:, 3, :]
    k_t = z[:, 4, :] * inv_sqrt_h
    v_t = z[:, 5, :]

    f_t = jax.nn.sigmoid(f_til)
    o_t = jax.nn.sigmoid(o_til)
    # log_sigmoid avoids the log(sigmoid(.)) -inf underflow of the reference.
    m_t = jnp.maximum(jax.nn.log_sigmoid(f_til) + m_ref[...], i_til)
    i_prime = jnp.exp(i_til - m_t)
    iv = i_prime * v_t
    n_t = f_t * n_ref[...] + i_prime * k_t

    norm_inner = jnp.sum(n_t * q_t, axis=-1, keepdims=True)       # (B, 1)
    divisor = jnp.maximum(jnp.abs(norm_inner), 1.0)
    kq = jnp.sum(k_t * q_t, axis=-1, keepdims=True)               # (B, 1)

    alpha = o_t * f_t / divisor               # multiplies  (C_prev[i,:] . q)
    beta = o_t * iv * (kq / divisor)          # rank-1 readout term

    n_out[...] = n_t
    m_out[...] = m_t
    colvecs_ref[:, 0:1, :] = k_t[:, None, :]
    colvecs_ref[:, 1:2, :] = q_t[:, None, :]
    rowvecs_ref[:, 0:1, :] = f_t[:, None, :]
    rowvecs_ref[:, 1:2, :] = iv[:, None, :]
    rowvecs_ref[:, 2:3, :] = alpha[:, None, :]
    rowvecs_ref[:, 3:4, :] = beta[:, None, :]


# ---------------------------------------------------------------------------
# Stage 3: C update + fused readout.  Grid = (batch tiles, C row tiles),
# both "parallel"; each (bt, tr, H) block of C is touched exactly once.
# Per-row coefficients come in sublane-major (bt, tr, 4) -> no relayouts.
# ---------------------------------------------------------------------------
def _state_update_kernel(rowvecs_ref, colvecs_ref, c_ref, h_ref, c_out_ref):
    k_t = colvecs_ref[:, 0:1, :]          # (bt, 1, H)
    q_t = colvecs_ref[:, 1:2, :]          # (bt, 1, H)
    f_col = rowvecs_ref[:, :, 0:1]        # (bt, tr, 1)
    iv_col = rowvecs_ref[:, :, 1:2]
    alpha = rowvecs_ref[:, :, 2:3]
    beta = rowvecs_ref[:, :, 3:4]

    c_prev = c_ref[...]                   # (bt, tr, H)
    cq = jnp.sum(c_prev * q_t, axis=-1, keepdims=True)     # (bt, tr, 1)

    h_ref[...] = alpha * cq + beta                          # (bt, tr, 1)
    c_out_ref[...] = f_col * c_prev + iv_col * k_t          # (bt, tr, H)


# ---------------------------------------------------------------------------
# Wrapper.
# ---------------------------------------------------------------------------
def pack_mlstm_params(W, b):
    """Fuse (6, I, H) weights / (6, 1, H) biases into (I, 6H) / (1, 6H).
    Call ONCE outside the timestep loop (hoists the transpose off the
    per-step HBM path)."""
    six, in_dim, hidden = W.shape
    W6 = jnp.transpose(W, (1, 0, 2)).reshape(in_dim, six * hidden).astype(jnp.float32)
    b6 = b.reshape(1, six * hidden).astype(jnp.float32)
    return W6, b6


@functools.partial(jax.jit, static_argnames=("row_tile", "batch_tile"),
                   donate_argnums=(3,))   # donate C -> true in-place state update
def mlstm_cell(x, W6, b6, C, n, m, *, row_tile=None, batch_tile=None):
    B, I = x.shape
    six_h = W6.shape[-1]
    H = six_h // 6
    f32 = jnp.float32

    xf = x if x.dtype == f32 else x.astype(f32)
    W6f = W6 if W6.dtype == f32 else W6.astype(f32)
    b6f = b6 if b6.dtype == f32 else b6.astype(f32)
    Cf = C if C.dtype == f32 else C.astype(f32)     # no copy when already f32
    nf = n if n.dtype == f32 else n.astype(f32)
    mf = m if m.dtype == f32 else m.astype(f32)

    # ----- stage 1: fused gate projection, tiled over (N=6H, K=I) -----------
    tk, tn = _pick_proj_tiles(I, six_h)
    gates = pl.pallas_call(
        _gate_proj_kernel,
        out_shape=jax.ShapeDtypeStruct((B, six_h), f32),
        grid=(six_h // tn, I // tk),
        in_specs=[
            pl.BlockSpec((B, tk), lambda n_, k_: (0, k_)),
            pl.BlockSpec((tk, tn), lambda n_, k_: (k_, n_)),
            pl.BlockSpec((1, tn), lambda n_, k_: (0, n_)),
        ],
        out_specs=pl.BlockSpec((B, tn), lambda n_, k_: (0, n_)),
        scratch_shapes=[pltpu.VMEM((B, tn), f32)],
        compiler_params=pltpu.CompilerParams(
            dimension_semantics=("parallel", "arbitrary"),
            vmem_limit_bytes=32 * 1024 * 1024,
        ),
    )(xf, W6f, b6f)
    gates3 = gates.reshape(B, 6, H)

    # ----- stage 2: per-batch gate math (tiny, once per call) ---------------
    # TODO(synk): grid this over batch blocks if B*6*H*4 ever approaches VMEM.
    vmem = pl.BlockSpec(memory_space=pltpu.MemorySpace.VMEM)
    rowvecs_t, colvecs, n_t, m_t = pl.pallas_call(
        _gate_math_kernel,
        out_shape=(
            jax.ShapeDtypeStruct((B, 4, H), f32),
            jax.ShapeDtypeStruct((B, 2, H), f32),
            jax.ShapeDtypeStruct((B, H), f32),
            jax.ShapeDtypeStruct((B, H), f32),
        ),
        in_specs=[vmem, vmem, vmem],
        out_specs=(vmem, vmem, vmem, vmem),
    )(gates3, nf, mf)
    # One-time, tiny relayout so stage 3 gets sublane-major per-row coeffs.
    rowvecs = jnp.transpose(rowvecs_t, (0, 2, 1))          # (B, H, 4)

    # ----- stage 3: C update + readout over (batch tiles, row tiles) --------
    bt, tr = _pick_state_tiles(B, H, row_tile, batch_tile)
    assert B % bt == 0, "batch_tile must divide batch"
    assert H % tr == 0, "row_tile must divide hidden_size"
    assert tr == H or tr % 8 == 0, "row_tile must be a multiple of 8"

    h3, C_t = pl.pallas_call(
        _state_update_kernel,
        out_shape=(
            jax.ShapeDtypeStruct((B, H, 1), f32),           # h_t (column layout)
            jax.ShapeDtypeStruct((B, H, H), f32),           # C_t
        ),
        grid=(B // bt, H // tr),
        in_specs=[
            pl.BlockSpec((bt, tr, 4), lambda b_, r_: (b_, r_, 0)),   # f,iv,alpha,beta
            pl.BlockSpec((bt, 2, H), lambda b_, r_: (b_, 0, 0)),     # k, q
            pl.BlockSpec((bt, tr, H), lambda b_, r_: (b_, r_, 0)),   # C_prev tile
        ],
        out_specs=(
            pl.BlockSpec((bt, tr, 1), lambda b_, r_: (b_, r_, 0)),   # h rows
            pl.BlockSpec((bt, tr, H), lambda b_, r_: (b_, r_, 0)),   # C_t tile
        ),
        input_output_aliases={2: 1},            # C (input 2) -> C_t (output 1)
        compiler_params=pltpu.CompilerParams(
            dimension_semantics=("parallel", "parallel"),
            vmem_limit_bytes=48 * 1024 * 1024,   # <= v7x's 64 MiB / TC
        ),
    )(rowvecs, colvecs, Cf)

    return h3.reshape(B, H), C_t, n_t, m_t


# ---------------------------------------------------------------------------
# Pure-JAX reference mirroring the PyTorch forward, for validation.
# ---------------------------------------------------------------------------
def mlstm_cell_ref(x, W, b, C, n, m):
    H = W.shape[-1]
    zs = [x @ W[g] + b[g] for g in range(6)]
    i_tilda, f_tilda, o_tilda, q_t, k_t, v_t = zs
    k_t = k_t / jnp.sqrt(jnp.asarray(H, x.dtype))
    i_t = jnp.exp(i_tilda)
    f_t = jax.nn.sigmoid(f_tilda)
    o_t = jax.nn.sigmoid(o_tilda)
    m_t = jnp.maximum(jnp.log(f_t) + m, jnp.log(i_t))
    i_prime = jnp.exp(i_tilda - m_t)
    C_t = f_t[:, :, None] * C + i_prime[:, :, None] * jnp.einsum('bi,bk->bik', v_t, k_t)
    n_t = f_t * n + i_prime * k_t
    normalize_inner = jnp.diagonal(n_t @ q_t.T)
    divisor = jnp.maximum(jnp.abs(normalize_inner), jnp.ones_like(normalize_inner))
    h_tilda = jnp.einsum('bkj,bj->bk', C_t, q_t) / divisor[:, None]
    h_t = o_t * h_tilda
    return h_t, C_t, n_t, m_t


def _run_case(key, B, I, H, row_tile=None, batch_tile=None):
    kx, kw, kb, kc, kn, km = jax.random.split(key, 6)
    x = jax.random.normal(kx, (B, I), dtype=jnp.float32)
    W = jax.random.uniform(kw, (6, I, H), dtype=jnp.float32,
                           minval=-1.0 / math.sqrt(I), maxval=1.0 / math.sqrt(I))
    b = jax.random.uniform(kb, (6, 1, H), dtype=jnp.float32,
                           minval=-1.0 / math.sqrt(I), maxval=1.0 / math.sqrt(I))
    C = 0.1 * jax.random.normal(kc, (B, H, H), dtype=jnp.float32)
    n = 0.1 * jax.random.normal(kn, (B, H), dtype=jnp.float32)
    m = 0.1 * jax.random.normal(km, (B, H), dtype=jnp.float32)

    # Reference first: C is donated to the kernel call below (in-place update).
    h_r, C_r, n_r, m_r = jax.block_until_ready(mlstm_cell_ref(x, W, b, C, n, m))

    W6, b6 = pack_mlstm_params(W, b)   # one-time packing, outside the step loop
    h_t, C_t, n_t, m_t = jax.block_until_ready(
        mlstm_cell(x, W6, b6, C, n, m, row_tile=row_tile, batch_tile=batch_tile))

    assert jnp.allclose(h_t, h_r, atol=1e-4, rtol=1e-4)
    assert jnp.allclose(C_t, C_r, atol=1e-5, rtol=1e-5)
    assert jnp.allclose(n_t, n_r, atol=1e-5, rtol=1e-5)
    assert jnp.allclose(m_t, m_r, atol=1e-5, rtol=1e-5)


if __name__ == "__main__":
    key = jax.random.PRNGKey(0)
    k1, k2 = jax.random.split(key)
    # Small case: batch-blocked (bt = B), full C rows, grid = (1, 1).
    _run_case(k1, B=8, I=16, H=32)
    # Larger hidden size exercising batch + row tiling (grid = (2, 2)).
    _run_case(k2, B=4, I=64, H=256, row_tile=128, batch_tile=2)
    print("KERNEL_OK")
</pallas_src>

<mosaic_0001>
module attributes {stable_mosaic.version = 11 : i64} {
  func.func @_gate_proj_kernel(%arg0: i32, %arg1: i32, %arg2: memref<8x16xf32, #tpu.memory_space<vmem>>, %arg3: memref<16x192xf32, #tpu.memory_space<vmem>>, %arg4: memref<1x192xf32, #tpu.memory_space<vmem>>, %arg5: memref<8x192xf32, #tpu.memory_space<vmem>>, %arg6: memref<8x192xf32, #tpu.memory_space<vmem>>) attributes {dimension_semantics = [#tpu.dimension_semantics<parallel>, #tpu.dimension_semantics<arbitrary>], iteration_bounds = array<i64: 1, 1>, scalar_prefetch = 0 : i64, scratch_operands = 1 : i64, tpu.core_type = #tpu.core_type<tc>, window_params = [{transform_indices = @transform_0, window_bounds = array<i64: 8, 16>}, {transform_indices = @transform_1, window_bounds = array<i64: 16, 192>}, {transform_indices = @transform_2, window_bounds = array<i64: 1, 192>}, {transform_indices = @transform_3, window_bounds = array<i64: 8, 192>}]} {
    %c0_i32 = arith.constant 0 : i32
    %0 = arith.cmpi eq, %arg1, %c0_i32 : i32
    %1 = arith.extui %0 : i1 to i32
    %c0_i32_0 = arith.constant 0 : i32
    %2 = arith.cmpi ne, %1, %c0_i32_0 : i32
    scf.if %2 {
      %cst_10 = arith.constant 0.000000e+00 : f32
      %12 = vector.broadcast %cst_10 : f32 to vector<8x192xf32>
      %c0_11 = arith.constant 0 : index
      %c0_12 = arith.constant 0 : index
      %13 = vector.load %arg6[%c0_11, %c0_12] : memref<8x192xf32, #tpu.memory_space<vmem>>, vector<8x192xf32>
      tpu.vector_store %arg6[%c0_11, %c0_12], %12 {strides = array<i32>} : memref<8x192xf32, #tpu.memory_space<vmem>>, vector<8x192xf32>,
    } else {
    }
    %c0 = arith.constant 0 : index
    %c0_1 = arith.constant 0 : index
    %3 = vector.load %arg6[%c0, %c0_1] : memref<8x192xf32, #tpu.memory_space<vmem>>, vector<8x192xf32>
    %c0_2 = arith.constant 0 : index
    %c0_3 = arith.constant 0 : index
    %4 = vector.load %arg2[%c0_2, %c0_3] : memref<8x16xf32, #tpu.memory_space<vmem>>, vector<8x16xf32>
    %c0_4 = arith.constant 0 : index
    %c0_5 = arith.constant 0 : index
    %5 = vector.load %arg3[%c0_4, %c0_5] : memref<16x192xf32, #tpu.memory_space<vmem>>, vector<16x192xf32>
    %cst = arith.constant dense<0.000000e+00> : vector<8x192xf32>
    %6 = tpu.matmul %4, %5, %cst {dimension_numbers = #tpu.dot_dimension_numbers<[1], [0], [0], [1], [0, 0, 1, 1], [], []>} : vector<8x16xf32>, vector<16x192xf32>, vector<8x192xf32> -> vector<8x192xf32>
    %7 = arith.addf %3, %6 : vector<8x192xf32>
    %c0_6 = arith.constant 0 : index
    %c0_7 = arith.constant 0 : index
    %8 = vector.load %arg6[%c0_6, %c0_7] : memref<8x192xf32, #tpu.memory_space<vmem>>, vector<8x192xf32>
    tpu.vector_store %arg6[%c0_6, %c0_7], %7 {strides = array<i32>} : memref<8x192xf32, #tpu.memory_space<vmem>>, vector<8x192xf32>,
    %c0_i32_8 = arith.constant 0 : i32
    %9 = arith.cmpi eq, %arg1, %c0_i32_8 : i32
    %10 = arith.extui %9 : i1 to i32
    %c0_i32_9 = arith.constant 0 : i32
    %11 = arith.cmpi ne, %10, %c0_i32_9 : i32
    scf.if %11 {
      %c0_10 = arith.constant 0 : index
      %c0_11 = arith.constant 0 : index
      %12 = vector.load %arg6[%c0_10, %c0_11] : memref<8x192xf32, #tpu.memory_space<vmem>>, vector<8x192xf32>
      %c0_12 = arith.constant 0 : index
      %c0_13 = arith.constant 0 : index
      %13 = vector.load %arg4[%c0_12, %c0_13] : memref<1x192xf32, #tpu.memory_space<vmem>>, vector<1x192xf32>
      %14 = vector.broadcast %13 : vector<1x192xf32> to vector<8x192xf32>
      %15 = arith.addf %12, %14 : vector<8x192xf32>
      %c0_14 = arith.constant 0 : index
      %c0_15 = arith.constant 0 : index
      %16 = vector.load %arg5[%c0_14, %c0_15] : memref<8x192xf32, #tpu.memory_space<vmem>>, vector<8x192xf32>
      tpu.vector_store %arg5[%c0_14, %c0_15], %15 {strides = array<i32>} : memref<8x192xf32, #tpu.memory_space<vmem>>, vector<8x192xf32>,
    } else {
    }
    return
  }
  func.func @transform_0(%arg0: i32, %arg1: i32) -> (i32, i32) {
    %c0_i32 = arith.constant 0 : i32
    %c0_i32_0 = arith.constant 0 : i32
    return %c0_i32, %arg1 : i32, i32
  }
  func.func @transform_1(%arg0: i32, %arg1: i32) -> (i32, i32) {
    %c0_i32 = arith.constant 0 : i32
    return %arg1, %arg0 : i32, i32
  }
  func.func @transform_2(%arg0: i32, %arg1: i32) -> (i32, i32) {
    %c0_i32 = arith.constant 0 : i32
    %c0_i32_0 = arith.constant 0 : i32
    return %c0_i32, %arg0 : i32, i32
  }
  func.func @transform_3(%arg0: i32, %arg1: i32) -> (i32, i32) {
    %c0_i32 = arith.constant 0 : i32
    %c0_i32_0 = arith.constant 0 : i32
    return %c0_i32, %arg0 : i32, i32
  }
}

module attributes {stable_mosaic.version = 11 : i64} {
  func.func @_gate_math_kernel(%arg0: memref<8x6x32xf32, #tpu.memory_space<vmem>>, %arg1: memref<8x32xf32, #tpu.memory_space<vmem>>, %arg2: memref<8x32xf32, #tpu.memory_space<vmem>>, %arg3: memref<8x4x32xf32, #tpu.memory_space<vmem>>, %arg4: memref<8x2x32xf32, #tpu.memory_space<vmem>>, %arg5: memref<8x32xf32, #tpu.memory_space<vmem>>, %arg6: memref<8x32xf32, #tpu.memory_space<vmem>>) attributes {dimension_semantics = [], scalar_prefetch = 0 : i64, scratch_operands = 0 : i64, tpu.core_type = #tpu.core_type<tc>} {
    %c0 = arith.constant 0 : index
    %c0_0 = arith.constant 0 : index
    %c0_1 = arith.constant 0 : index
    %0 = vector.load %arg0[%c0, %c0_0, %c0_1] : memref<8x6x32xf32, #tpu.memory_space<vmem>>, vector<8x6x32xf32>
    %1 = vector.extract_strided_slice %0 {offsets = [0, 0, 0], sizes = [8, 1, 32], strides = [1, 1, 1]} : vector<8x6x32xf32> to vector<8x1x32xf32>
    %2 = vector.shape_cast %1 : vector<8x1x32xf32> to vector<8x32xf32>
    %3 = vector.extract_strided_slice %0 {offsets = [0, 1, 0], sizes = [8, 1, 32], strides = [1, 1, 1]} : vector<8x6x32xf32> to vector<8x1x32xf32>
    %4 = vector.shape_cast %3 : vector<8x1x32xf32> to vector<8x32xf32>
    %5 = vector.extract_strided_slice %0 {offsets = [0, 2, 0], sizes = [8, 1, 32], strides = [1, 1, 1]} : vector<8x6x32xf32> to vector<8x1x32xf32>
    %6 = vector.shape_cast %5 : vector<8x1x32xf32> to vector<8x32xf32>
    %7 = vector.extract_strided_slice %0 {offsets = [0, 3, 0], sizes = [8, 1, 32], strides = [1, 1, 1]} : vector<8x6x32xf32> to vector<8x1x32xf32>
    %8 = vector.shape_cast %7 : vector<8x1x32xf32> to vector<8x32xf32>
    %9 = vector.extract_strided_slice %0 {offsets = [0, 4, 0], sizes = [8, 1, 32], strides = [1, 1, 1]} : vector<8x6x32xf32> to vector<8x1x32xf32>
    %10 = vector.shape_cast %9 : vector<8x1x32xf32> to vector<8x32xf32>
    %cst = arith.constant 0.176776692 : f32
    %11 = vector.broadcast %cst : f32 to vector<8x32xf32>
    %12 = arith.mulf %10, %11 : vector<8x32xf32>
    %13 = vector.extract_strided_slice %0 {offsets = [0, 5, 0], sizes = [8, 1, 32], strides = [1, 1, 1]} : vector<8x6x32xf32> to vector<8x1x32xf32>
    %14 = vector.shape_cast %13 : vector<8x1x32xf32> to vector<8x32xf32>
    %15 = arith.negf %4 : vector<8x32xf32>
    %16 = math.exp %15 : vector<8x32xf32>
    %cst_2 = arith.constant 1.000000e+00 : f32
    %17 = vector.broadcast %cst_2 : f32 to vector<8x32xf32>
    %18 = arith.addf %17, %16 : vector<8x32xf32>
    %19 = arith.divf %17, %18 : vector<8x32xf32>
    %20 = arith.negf %6 : vector<8x32xf32>
    %21 = math.exp %20 : vector<8x32xf32>
    %cst_3 = arith.constant 1.000000e+00 : f32
    %22 = vector.broadcast %cst_3 : f32 to vector<8x32xf32>
    %23 = arith.addf %22, %21 : vector<8x32xf32>
    %24 = arith.divf %22, %23 : vector<8x32xf32>
    %cst_4 = arith.constant 0.000000e+00 : f32
    %25 = vector.broadcast %cst_4 : f32 to vector<8x32xf32>
    %26 = arith.subf %25, %4 : vector<8x32xf32>
    %cst_5 = arith.constant 0.000000e+00 : f32
    %27 = vector.broadcast %cst_5 : f32 to vector<8x32xf32>
    %28 = arith.maximumf %26, %27 : vector<8x32xf32>
    %29 = vector.broadcast %cst_5 : f32 to vector<8x32xf32>
    %30 = arith.subf %26, %29 : vector<8x32xf32>
    %31 = arith.cmpf one, %30, %30 : vector<8x32xf32>
    %32 = vector.broadcast %cst_5 : f32 to vector<8x32xf32>
    %33 = arith.addf %26, %32 : vector<8x32xf32>
    %34 = math.absf %30 : vector<8x32xf32>
    %cst_6 = arith.constant 0.000000e+00 : f32
    %35 = vector.broadcast %cst_6 : f32 to vector<8x32xf32>
    %36 = arith.subf %35, %34 : vector<8x32xf32>
    %37 = math.exp %36 : vector<8x32xf32>
    %38 = math.log1p %37 : vector<8x32xf32>
    %39 = arith.addf %28, %38 : vector<8x32xf32>
    %40 = arith.select %31, %33, %39 : vector<8x32xi1>, vector<8x32xf32>
    %cst_7 = arith.constant 0.000000e+00 : f32
    %41 = vector.broadcast %cst_7 : f32 to vector<8x32xf32>
    %42 = arith.subf %41, %40 : vector<8x32xf32>
    %c0_8 = arith.constant 0 : index
    %c0_9 = arith.constant 0 : index
    %43 = vector.load %arg2[%c0_8, %c0_9] : memref<8x32xf32, #tpu.memory_space<vmem>>, vector<8x32xf32>
    %44 = arith.addf %42, %43 : vector<8x32xf32>
    %45 = arith.maximumf %44, %2 : vector<8x32xf32>
    %46 = arith.subf %2, %45 : vector<8x32xf32>
    %47 = math.exp %46 : vector<8x32xf32>
    %48 = arith.mulf %47, %14 : vector<8x32xf32>
    %c0_10 = arith.constant 0 : index
    %c0_11 = arith.constant 0 : index
    %49 = vector.load %arg1[%c0_10, %c0_11] : memref<8x32xf32, #tpu.memory_space<vmem>>, vector<8x32xf32>
    %50 = arith.mulf %19, %49 : vector<8x32xf32>
    %51 = arith.mulf %47, %12 : vector<8x32xf32>
    %52 = arith.addf %50, %51 : vector<8x32xf32>
    %53 = arith.mulf %52, %8 : vector<8x32xf32>
    %cst_12 = arith.constant dense<0.000000e+00> : vector<8xf32>
    %54 = vector.multi_reduction <add>, %53, %cst_12 [1] : vector<8x32xf32> to vector<8xf32>
    %55 = vector.shape_cast %54 : vector<8xf32> to vector<8x1xf32>
    %56 = math.absf %55 : vector<8x1xf32>
    %cst_13 = arith.constant 1.000000e+00 : f32
    %57 = vector.broadcast %cst_13 : f32 to vector<8x1xf32>
    %58 = arith.maximumf %56, %57 : vector<8x1xf32>
    %59 = arith.mulf %12, %8 : vector<8x32xf32>
    %cst_14 = arith.constant dense<0.000000e+00> : vector<8xf32>
    %60 = vector.multi_reduction <add>, %59, %cst_14 [1] : vector<8x32xf32> to vector<8xf32>
    %61 = vector.shape_cast %60 : vector<8xf32> to vector<8x1xf32>
    %62 = arith.mulf %24, %19 : vector<8x32xf32>
    %63 = vector.broadcast %58 : vector<8x1xf32> to vector<8x32xf32>
    %64 = arith.divf %62, %63 : vector<8x32xf32>
    %65 = arith.mulf %24, %48 : vector<8x32xf32>
    %66 = arith.divf %61, %58 : vector<8x1xf32>
    %67 = vector.broadcast %66 : vector<8x1xf32> to vector<8x32xf32>
    %68 = arith.mulf %65, %67 : vector<8x32xf32>
    %c0_15 = arith.constant 0 : index
    %c0_16 = arith.constant 0 : index
    %69 = vector.load %arg5[%c0_15, %c0_16] : memref<8x32xf32, #tpu.memory_space<vmem>>, vector<8x32xf32>
    tpu.vector_store %arg5[%c0_15, %c0_16], %52 {strides = array<i32>} : memref<8x32xf32, #tpu.memory_space<vmem>>, vector<8x32xf32>,
    %c0_17 = arith.constant 0 : index
    %c0_18 = arith.constant 0 : index
    %70 = vector.load %arg6[%c0_17, %c0_18] : memref<8x32xf32, #tpu.memory_space<vmem>>, vector<8x32xf32>
    tpu.vector_store %arg6[%c0_17, %c0_18], %45 {strides = array<i32>} : memref<8x32xf32, #tpu.memory_space<vmem>>, vector<8x32xf32>,
    %71 = vector.shape_cast %12 : vector<8x32xf32> to vector<8x1x32xf32>
    %c0_19 = arith.constant 0 : index
    %c0_20 = arith.constant 0 : index
    %c0_21 = arith.constant 0 : index
    %72 = vector.load %arg4[%c0_19, %c0_20, %c0_21] : memref<8x2x32xf32, #tpu.memory_space<vmem>>, vector<8x1x32xf32>
    tpu.vector_store %arg4[%c0_19, %c0_20, %c0_21], %71 {strides = array<i32>} : memref<8x2x32xf32, #tpu.memory_space<vmem>>, vector<8x1x32xf32>,
    %73 = vector.shape_cast %8 : vector<8x32xf32> to vector<8x1x32xf32>
    %c0_22 = arith.constant 0 : index
    %c1 = arith.constant 1 : index
    %c0_23 = arith.constant 0 : index
    %74 = vector.load %arg4[%c0_22, %c1, %c0_23] : memref<8x2x32xf32, #tpu.memory_space<vmem>>, vector<8x1x32xf32>
    tpu.vector_store %arg4[%c0_22, %c1, %c0_23], %73 {strides = array<i32>} : memref<8x2x32xf32, #tpu.memory_space<vmem>>, vector<8x1x32xf32>,
    %75 = vector.shape_cast %19 : vector<8x32xf32> to vector<8x1x32xf32>
    %c0_24 = arith.constant 0 : index
    %c0_25 = arith.constant 0 : index
    %c0_26 = arith.constant 0 : index
    %76 = vector.load %arg3[%c0_24, %c0_25, %c0_26] : memref<8x4x32xf32, #tpu.memory_space<vmem>>, vector<8x1x32xf32>
    tpu.vector_store %arg3[%c0_24, %c0_25, %c0_26], %75 {strides = array<i32>} : memref<8x4x32xf32, #tpu.memory_space<vmem>>, vector<8x1x32xf32>,
    %77 = vector.shape_cast %48 : vector<8x32xf32> to vector<8x1x32xf32>
    %c0_27 = arith.constant 0 : index
    %c1_28 = arith.constant 1 : index
    %c0_29 = arith.constant 0 : index
    %78 = vector.load %arg3[%c0_27, %c1_28, %c0_29] : memref<8x4x32xf32, #tpu.memory_space<vmem>>, vector<8x1x32xf32>
    tpu.vector_store %arg3[%c0_27, %c1_28, %c0_29], %77 {strides = array<i32>} : memref<8x4x32xf32, #tpu.memory_space<vmem>>, vector<8x1x32xf32>,
    %79 = vector.shape_cast %64 : vector<8x32xf32> to vector<8x1x32xf32>
    %c0_30 = arith.constant 0 : index
    %c2 = arith.constant 2 : index
    %c0_31 = arith.constant 0 : index
    %80 = vector.load %arg3[%c0_30, %c2, %c0_31] : memref<8x4x32xf32, #tpu.memory_space<vmem>>, vector<8x1x32xf32>
    tpu.vector_store %arg3[%c0_30, %c2, %c0_31], %79 {strides = array<i32>} : memref<8x4x32xf32, #tpu.memory_space<vmem>>, vector<8x1x32xf32>,
    %81 = vector.shape_cast %68 : vector<8x32xf32> to vector<8x1x32xf32>
    %c0_32 = arith.constant 0 : index
    %c3 = arith.constant 3 : index
    %c0_33 = arith.constant 0 : index
    %82 = vector.load %arg3[%c0_32, %c3, %c0_33] : memref<8x4x32xf32, #tpu.memory_space<vmem>>, vector<8x1x32xf32>
    tpu.vector_store %arg3[%c0_32, %c3, %c0_33], %81 {strides = array<i32>} : memref<8x4x32xf32, #tpu.memory_space<vmem>>, vector<8x1x32xf32>,
    return
  }
}

module attributes {stable_mosaic.version = 11 : i64} {
  func.func @_state_update_kernel(%arg0: i32, %arg1: i32, %arg2: memref<8x32x4xf32, #tpu.memory_space<vmem>>, %arg3: memref<8x2x32xf32, #tpu.memory_space<vmem>>, %arg4: memref<8x32x32xf32, #tpu.memory_space<vmem>>, %arg5: memref<8x32x1xf32, #tpu.memory_space<vmem>>, %arg6: memref<8x32x32xf32, #tpu.memory_space<vmem>>) attributes {dimension_semantics = [#tpu.dimension_semantics<parallel>, #tpu.dimension_semantics<parallel>], iteration_bounds = array<i64: 1, 1>, scalar_prefetch = 0 : i64, scratch_operands = 0 : i64, tpu.core_type = #tpu.core_type<tc>, window_params = [{transform_indices = @transform_0, window_bounds = array<i64: 8, 32, 4>}, {transform_indices = @transform_1, window_bounds = array<i64: 8, 2, 32>}, {transform_indices = @transform_2, window_bounds = array<i64: 8, 32, 32>}, {transform_indices = @transform_3, window_bounds = array<i64: 8, 32, 1>}, {transform_indices = @transform_4, window_bounds = array<i64: 8, 32, 32>}]} {
    %c0 = arith.constant 0 : index
    %c0_0 = arith.constant 0 : index
    %c0_1 = arith.constant 0 : index
    %0 = vector.load %arg3[%c0, %c0_0, %c0_1] : memref<8x2x32xf32, #tpu.memory_space<vmem>>, vector<8x1x32xf32>
    %c0_2 = arith.constant 0 : index
    %c1 = arith.constant 1 : index
    %c0_3 = arith.constant 0 : index
    %1 = vector.load %arg3[%c0_2, %c1, %c0_3] : memref<8x2x32xf32, #tpu.memory_space<vmem>>, vector<8x1x32xf32>
    %c0_4 = arith.constant 0 : index
    %c0_5 = arith.constant 0 : index
    %c0_6 = arith.constant 0 : index
    %2 = vector.load %arg2[%c0_4, %c0_5, %c0_6] : memref<8x32x4xf32, #tpu.memory_space<vmem>>, vector<8x32x1xf32>
    %c0_7 = arith.constant 0 : index
    %c0_8 = arith.constant 0 : index
    %c1_9 = arith.constant 1 : index
    %3 = vector.load %arg2[%c0_7, %c0_8, %c1_9] : memref<8x32x4xf32, #tpu.memory_space<vmem>>, vector<8x32x1xf32>
    %c0_10 = arith.constant 0 : index
    %c0_11 = arith.constant 0 : index
    %c2 = arith.constant 2 : index
    %4 = vector.load %arg2[%c0_10, %c0_11, %c2] : memref<8x32x4xf32, #tpu.memory_space<vmem>>, vector<8x32x1xf32>
    %c0_12 = arith.constant 0 : index
    %c0_13 = arith.constant 0 : index
    %c3 = arith.constant 3 : index
    %5 = vector.load %arg2[%c0_12, %c0_13, %c3] : memref<8x32x4xf32, #tpu.memory_space<vmem>>, vector<8x32x1xf32>
    %c0_14 = arith.constant 0 : index
    %c0_15 = arith.constant 0 : index
    %c0_16 = arith.constant 0 : index
    %6 = vector.load %arg4[%c0_14, %c0_15, %c0_16] : memref<8x32x32xf32, #tpu.memory_space<vmem>>, vector<8x32x32xf32>
    %7 = vector.broadcast %1 : vector<8x1x32xf32> to vector<8x32x32xf32>
    %8 = arith.mulf %6, %7 : vector<8x32x32xf32>
    %cst = arith.constant dense<0.000000e+00> : vector<8x32xf32>
    %9 = vector.multi_reduction <add>, %8, %cst [2] : vector<8x32x32xf32> to vector<8x32xf32>
    %10 = vector.shape_cast %9 : vector<8x32xf32> to vector<8x32x1xf32>
    %11 = arith.mulf %4, %10 : vector<8x32x1xf32>
    %12 = arith.addf %11, %5 : vector<8x32x1xf32>
    %c0_17 = arith.constant 0 : index
    %c0_18 = arith.constant 0 : index
    %c0_19 = arith.constant 0 : index
    %13 = vector.load %arg5[%c0_17, %c0_18, %c0_19] : memref<8x32x1xf32, #tpu.memory_space<vmem>>, vector<8x32x1xf32>
    tpu.vector_store %arg5[%c0_17, %c0_18, %c0_19], %12 {strides = array<i32>} : memref<8x32x1xf32, #tpu.memory_space<vmem>>, vector<8x32x1xf32>,
    %14 = vector.broadcast %2 : vector<8x32x1xf32> to vector<8x32x32xf32>
    %15 = arith.mulf %14, %6 : vector<8x32x32xf32>
    %16 = vector.broadcast %3 : vector<8x32x1xf32> to vector<8x32x32xf32>
    %17 = vector.broadcast %0 : vector<8x1x32xf32> to vector<8x32x32xf32>
    %18 = arith.mulf %16, %17 : vector<8x32x32xf32>
    %19 = arith.addf %15, %18 : vector<8x32x32xf32>
    %c0_20 = arith.constant 0 : index
    %c0_21 = arith.constant 0 : index
    %c0_22 = arith.constant 0 : index
    %20 = vector.load %arg6[%c0_20, %c0_21, %c0_22] : memref<8x32x32xf32, #tpu.memory_space<vmem>>, vector<8x32x32xf32>
    tpu.vector_store %arg6[%c0_20, %c0_21, %c0_22], %19 {strides = array<i32>} : memref<8x32x32xf32, #tpu.memory_space<vmem>>, vector<8x32x32xf32>,
    return
  }
  func.func @transform_0(%arg0: i32, %arg1: i32) -> (i32, i32, i32) {
    %c0_i32 = arith.constant 0 : i32
    %c0_i32_0 = arith.constant 0 : i32
    return %arg0, %arg1, %c0_i32 : i32, i32, i32
  }
  func.func @transform_1(%arg0: i32, %arg1: i32) -> (i32, i32, i32) {
    %c0_i32 = arith.constant 0 : i32
    %c0_i32_0 = arith.constant 0 : i32
    %c0_i32_1 = arith.constant 0 : i32
    return %arg0, %c0_i32, %c0_i32_0 : i32, i32, i32
  }
  func.func @transform_2(%arg0: i32, %arg1: i32) -> (i32, i32, i32) {
    %c0_i32 = arith.constant 0 : i32
    %c0_i32_0 = arith.constant 0 : i32
    return %arg0, %arg1, %c0_i32 : i32, i32, i32
  }
  func.func @transform_3(%arg0: i32, %arg1: i32) -> (i32, i32, i32) {
    %c0_i32 = arith.constant 0 : i32
    %c0_i32_0 = arith.constant 0 : i32
    return %arg0, %arg1, %c0_i32 : i32, i32, i32
  }
  func.func @transform_4(%arg0: i32, %arg1: i32) -> (i32, i32, i32) {
    %c0_i32 = arith.constant 0 : i32
    %c0_i32_0 = arith.constant 0 : i32
    return %arg0, %arg1, %c0_i32 : i32, i32, i32
  }
}

</mosaic_0001>

<bundles_post_ra>
// kernel: mlstm_cell.3
= control target key start
LH: loop header
LB: loop body
LE: loop exit
PB: predicated region body
PF: predicated region fallthrough
CT: control target
= control target key end

     0   :  { %8 = vsyncpa [#allocation4], 0  ;;  %s269_s0 = inlined_call_operand.hbm [shape: f32[8,16], index: 0, kind: input, shape index: {}]   ;;  %s270_s1 = inlined_call_operand.hbm [shape: f32[16,192], index: 1, kind: input, shape index: {}]   ;;  %s271_s2 = inlined_call_operand.hbm [shape: f32[1,192], index: 2, kind: input, shape index: {}]   ;;  %s272_s3 = inlined_call_operand.vmem [shape: f32[8,192], index: 3, kind: output, shape index: {}]  }
   0x1   :  { %9 = vsyncpa [#allocation6], 0  ;;  %s25_s14 = sshll.u32 %s270_s1, 4  ;;  %s225_s15 = smov [#allocation5]   ;;  %s26_s14 = int_to_ptr.hbm [resolvable:$true] %s25_s14 }
   0x2   :  { %s27_s16 = sshll.u32 %s225_s15, 4  ;;  %s15_s19 = sshll.u32 %s269_s0, 4  ;;  %s28_s16 = int_to_ptr.vmem [resolvable:$true] %s27_s16  ;;  %s16_s19 = int_to_ptr.hbm [resolvable:$true] %s15_s19 }
   0x3   :  { %s226_s20 = smov 256   ;;  %s227_s21 = smov 16  }
   0x4   :  { %33 = dma.hbm_to_vmem [thread:$0]  %s26_s14, 512, %s28_s16, [#allocation6], %s226_s20, %s226_s20, %s227_s21  }
   0x5   :  { %s228_s22 = smov [#allocation3]   ;;  %s39_s26 = sshll.u32 %s271_s2, 4  ;;  %s40_s26 = int_to_ptr.hbm [resolvable:$true] %s39_s26 }
   0x6   :  { %s17_s23 = sshll.u32 %s228_s22, 4  ;;  %s229_s1 = smov [#allocation7]   ;;  %s18_s23 = int_to_ptr.vmem [resolvable:$true] %s17_s23 }
   0x7   :  { %20 = dma.hbm_to_vmem [thread:$0]  %s16_s19, 128, %s18_s23, [#allocation4]  }
   0x8   :  { %s41_s27 = sshll.u32 %s229_s1, 4  ;;  %s42_s27 = int_to_ptr.vmem [resolvable:$true] %s41_s27 }
   0x9   :  { %44 = dma.hbm_to_vmem [thread:$0]  %s40_s26, 32, %s42_s27, [#allocation6]  }
   0xa   :  { %221 = dma.done.wait [#allocation4], 128  }
   0xb   :  { %222 = vsyncadd [#allocation4], 4294967168 }
   0xc   :  { %223 = dma.done.wait [#allocation6], 544  }
   0xd   :  { %224 = vsyncadd [#allocation6], 4294966752  ;;  %vm62_vm0 = vcmask 523264   ;;  %v230_v0 = vmov 0.0   ;;  %v69_v1 = vld [vmem:[#allocation5 + $0x10] sm:$0xff]  ;;  %v70_v2 = vld [vmem:[#allocation5 + $0x18] sm:$0xff] }
   0xe   :  { %63 = vst.msk [vmem:[#allocation2 + $0x8] sm:$0xff] %vm62_vm0, %v230_v0  ;;  %v67_v3 = vld [vmem:[#allocation5] sm:$0xff]  ;;  %89 = vmatpush.msra.mxu0 %v69_v1  ;;  %109 = vmatpush.msra.mxu1 %v70_v2  ;;  %v68_v4 = vld [vmem:[#allocation5 + $0x8] sm:$0xff]  ;;  %v66_v5 = vld [vmem:[#allocation3] sm:$0xff]  ;;  %vm71_vm1 = vcmask 130048  }
   0xf   :  { %v125_v6 = vld [vmem:[#allocation7] sm:$0x3] }
  0x10   :  { %90 = vmatpush.msra.mxu0 %v67_v3  ;;  %110 = vmatpush.msra.mxu1 %v68_v4  ;;  %v127_v8 = vperm.slane %v125_v6, 0  ;;  %v128_v13 = vperm.slane %v125_v6, 1 }
  0x11   :  { %141 = vmatmul.msk.f32.vlgmr.msra.gmra.mxu0 %vm71_vm1, %v66_v5  ;;  %142 = vmatmul.msk.f32.vlgmr.msra.gmra.mxu1 %vm71_vm1, %v66_v5 }
  0x15   :  { %v65_v7 = vld [vmem:[#allocation2 + $0x8] sm:$0xff] }
  0x8e   :  { %v92_v9 = vpop.f32.mrf.mxu0  ;;  %v112_v10 = vpop.f32.mrf.mxu1 }
  0x8f   :  { %v116_v11 = vadd.f32 %v112_v10, %v65_v7  ;;  %v131_v12 = vadd.f32 %v127_v8, %v92_v9 }
  0x91   :  { %119 = vst.msk [vmem:[#allocation2 + $0x8] sm:$0xff] %vm62_vm0, %v116_v11 }
  0x92   :  { %133 = vst [vmem:[%s272_s3] sm:$0xff] %v131_v12 }
  0x98   :  { %v124_v14 = vld [vmem:[#allocation2 + $0x8] sm:$0xff] }
  0x99   :  { %v132_v15 = vadd.f32 %v128_v13, %v124_v14 }
  0x9b   :  { %134 = vst.msk [vmem:[%s272_s3 + $0x8] sm:$0xff] %vm62_vm0, %v132_v15 }
  0x9c   :  { %139 = vsyncpa [#allocation4], 1 }
  0x9d   :  { %140 = vsyncpa [#allocation6], 1 }

// kernel: mlstm_cell.4
= control target key start
LH: loop header
LB: loop body
LE: loop exit
PB: predicated region body
PF: predicated region fallthrough
CT: control target
= control target key end

     0   :  { %12 = vsyncpa [#allocation3], 0  ;;  %s2347_s0 = inlined_call_operand.vmem [shape: f32[8,6,32], index: 0, kind: input, shape index: {}]   ;;  %s2348_s1 = inlined_call_operand.vmem [shape: f32[8,32], index: 1, kind: input, shape index: {}]   ;;  %s2349_s2 = inlined_call_operand.vmem [shape: f32[8,32], index: 2, kind: input, shape index: {}]   ;;  %s2350_s3 = inlined_call_operand.vmem [shape: f32[8,4,32], index: 3, kind: output, shape index: {0}]   ;;  %s2351_s4 = inlined_call_operand.vmem [shape: f32[8,2,32], index: 4, kind: output, shape index: {1}]   ;;  %s2352_s5 = inlined_call_operand.hbm [shape: f32[8,32], index: 5, kind: output, shape index: {2}]   ;;  %s2353_s6 = inlined_call_operand.hbm [shape: f32[8,32], index: 6, kind: output, shape index: {3}]  }
   0x1   :  { %v1259_v0 = vld [vmem:[%s2347_s0] sm:$0x3f]  ;;  %v1264_v1 = vld [vmem:[%s2347_s0 + $0x8] sm:$0x3f]  ;;  %v1269_v2 = vld [vmem:[%s2347_s0 + $0x10] sm:$0x3f] }
   0x2   :  { %v1274_v3 = vld [vmem:[%s2347_s0 + $0x18] sm:$0x3f]  ;;  %v1279_v4 = vld [vmem:[%s2347_s0 + $0x20] sm:$0x3f]  ;;  %v1055_v5 = vmul.f32 -1.442695, %v1259_v0 }
   0x3   :  { %v1056_v6 = vmul.f32 -1.442695, %v1264_v1  ;;  %v1057_v7 = vmul.f32 -1.442695, %v1269_v2  ;;  %v1058_v8 = vmul.f32 -1.442695, %v1274_v3 }
   0x4   :  { %v1288_v9 = vld [vmem:[%s2347_s0 + $0x28] sm:$0x3f]  ;;  %1068 = vpow2.f32 %v1055_v5  ;;  %v1059_v10 = vmul.f32 -1.442695, %v1279_v4 }
   0x5   :  { %1070 = vpow2.f32 %v1056_v6  ;;  %v1060_v11 = vmul.f32 -1.442695, %v1288_v9 }
   0x6   :  { %13 = vsyncpa [#allocation5], 0  ;;  %1072 = vpow2.f32 %v1057_v7  ;;  %v1295_v12 = vld [vmem:[%s2347_s0 + $0x30] sm:$0x3f]  ;;  %v1299_v16 = vmul.f32 0.17677669, %v1259_v0 }
   0x7   :  { %1074 = vpow2.f32 %v1058_v8  ;;  %v1061_v13 = vmul.f32 -1.442695, %v1295_v12  ;;  %v1302_v17 = vmul.f32 0.17677669, %v1264_v1  ;;  %v1307_v20 = vmul.f32 0.17677669, %v1269_v2 }
   0x8   :  { %1076 = vpow2.f32 %v1059_v10  ;;  %v1310_v21 = vmul.f32 0.17677669, %v1274_v3  ;;  %v1315_v24 = vmul.f32 0.17677669, %v1279_v4  ;;  %v1318_v25 = vmul.f32 0.17677669, %v1288_v9 }
   0x9   :  { %1078 = vpow2.f32 %v1060_v11  ;;  %v1324_v28 = vmul.f32 0.17677669, %v1295_v12  ;;  %v1330_v30 = vsub.f32 0.0, %v1259_v0  ;;  %v1335_v33 = vsub.f32 0.0, %v1264_v1  ;;  %s1219_s21 = smov [#allocation4]   ;;  %s1037_s25 = sshll.u32 %s2353_s6, 4  ;;  %s1038_s25 = int_to_ptr.hbm [resolvable:$true] %s1037_s25 }
   0xa   :  { %v1069_v14 = vpop.eup %1068  ;;  %1080 = vpow2.f32 %v1061_v13  ;;  %2380 = vst [vmem:[#allocation8_spill] sm:$0xff] %v1315_v24  ;;  %v1338_v34 = vsub.f32 0.0, %v1269_v2  ;;  %v1341_v35 = vsub.f32 0.0, %v1274_v3  ;;  %v1345_v36 = vsub.f32 0.0, %v1279_v4  ;;  %s1035_s22 = sshll.u32 %s1219_s21, 4  ;;  %s1220_s23 = smov [#allocation2]   ;;  %s1036_s22 = int_to_ptr.vmem [resolvable:$true] %s1035_s22 }
   0xb   :  { %v1071_v15 = vpop.eup %1070  ;;  %v1304_v18 = vadd.f32 1.0, %v1069_v14  ;;  %2381 = vst [vmem:[#allocation9_spill] sm:$0xff] %v1318_v25  ;;  %v1348_v37 = vsub.f32 0.0, %v1288_v9  ;;  %v1351_v38 = vsub.f32 0.0, %v1295_v12  ;;  %v220_v53 = vand.u32 2147483647, %v1330_v30 }
   0xc   :  { %v1073_v19 = vpop.eup %1072  ;;  %v1312_v22 = vadd.f32 1.0, %v1071_v15  ;;  %2382 = vst [vmem:[#allocation10_spill] sm:$0xff] %v1324_v28  ;;  %v221_v54 = vand.u32 2147483647, %v1335_v33  ;;  %v222_v46 = vand.u32 2147483647, %v1338_v34 }
   0xd   :  { %v1075_v23 = vpop.eup %1074  ;;  %v1320_v26 = vadd.f32 1.0, %v1073_v19  ;;  %1082 = vrcp.f32 %v1304_v18  ;;  %v79_v45 = vand.u32 2147483648, %v1304_v18  ;;  %vm73_vm0 = vweird.f32 %v1304_v18  ;;  %s1024_s24 = sshll.u32 %s1220_s23, 4  ;;  %s1026_s27 = sshll.u32 %s2352_s5, 4  ;;  %s1025_s24 = int_to_ptr.vmem [resolvable:$true] %s1024_s24  ;;  %s1027_s27 = int_to_ptr.hbm [resolvable:$true] %s1026_s27 }
   0xe   :  { %v1077_v27 = vpop.eup %1076  ;;  %v1326_v29 = vadd.f32 1.0, %v1075_v23  ;;  %1084 = vrcp.f32 %v1312_v22  ;;  %v94_v48 = vand.u32 2147483648, %v1312_v22  ;;  %v77_v55 = vand.u32 2147483647, %v1304_v18 }
   0xf   :  { %v1079_v31 = vpop.eup %1078  ;;  %v1332_v32 = vadd.f32 1.0, %v1077_v27  ;;  %1086 = vrcp.f32 %v1320_v26  ;;  %vm88_vm1 = vweird.f32 %v1312_v22  ;;  %v92_v57 = vand.u32 2147483647, %v1312_v22 }
  0x10   :  { %v1081_v43 = vpop.eup %1080  ;;  %v1357_v44 = vadd.f32 1.0, %v1079_v31  ;;  %1088 = vrcp.f32 %v1326_v29  ;;  %v1382_v60 = vor.u32 1.1754944e-38, %v79_v45  ;;  %vm103_vm2 = vweird.f32 %v1320_v26 }
  0x11   :  { %1090 = vrcp.f32 %v1332_v32  ;;  %v1386_v61 = vadd.f32 1.0, %v1081_v43  ;;  %v1388_v63 = vor.u32 1.1754944e-38, %v94_v48  ;;  %v107_v7 = vand.u32 2147483647, %v1320_v26 }
  0x12   :  { %1092 = vrcp.f32 %v1357_v44  ;;  %v109_v8 = vand.u32 2147483648, %v1320_v26  ;;  %vm118_vm3 = vweird.f32 %v1326_v29  ;;  %v122_v10 = vand.u32 2147483647, %v1326_v29 }
  0x13   :  { %v1362_v47 = vpop.eup %1082  ;;  %v124_v23 = vand.u32 2147483648, %v1326_v29  ;;  %vm133_vm5 = vweird.f32 %v1332_v32  ;;  %v139_v45 = vand.u32 2147483648, %v1332_v32  ;;  %1094 = vrcp.f32 %v1386_v61 }
  0x14   :  { %v1368_v51 = vpop.eup %1084  ;;  %v69_v52 = vmul.f32 %v1362_v47, %v1304_v18  ;;  %vm74_vm4 = vweird.f32 %v1362_v47  ;;  %vm1426_vm9 = vcmp.eq.f32.partialorder %v77_v55, 8.507059e+37  ;;  %vm1438_vm11 = vcmp.eq.f32.partialorder %v92_v57, 8.507059e+37 }
  0x15   :  { %v84_v56 = vmul.f32 %v1368_v51, %v1312_v22  ;;  %v1380_v58 = vpop.eup %1086  ;;  %vm89_vm6 = vweird.f32 %v1368_v51  ;;  %vm1420_vm7 = vmor %vm73_vm0, %vm74_vm4  ;;  %v125_v50 = vor.u32 1.1754944e-38, %v124_v23  ;;  %vm1447_vm12 = vcmp.eq.f32.partialorder %v107_v7, 8.507059e+37 }
  0x16   :  { %v70_v59 = vsub.f32 1.0, %v69_v52  ;;  %v99_v5 = vmul.f32 %v1380_v58, %v1320_v26  ;;  %v1392_v6 = vpop.eup %1088  ;;  %vm104_vm8 = vweird.f32 %v1380_v58  ;;  %vm1434_vm10 = vmor %vm88_vm1, %vm89_vm6  ;;  %v140_v57 = vor.u32 1.1754944e-38, %v139_v45 }
  0x17   :  { %v85_v62 = vsub.f32 1.0, %v84_v56  ;;  %v1398_v11 = vpop.eup %1090  ;;  %v114_v19 = vmul.f32 %v1392_v6, %v1326_v29  ;;  %v137_v56 = vand.u32 2147483647, %v1332_v32  ;;  %vm119_vm13 = vweird.f32 %v1392_v6  ;;  %vm1455_vm15 = vmor %vm103_vm2, %vm104_vm8 }
  0x18   :  { %v71_v13 = vmul.f32 %v1362_v47, %v70_v59  ;;  %v100_v15 = vsub.f32 1.0, %v99_v5  ;;  %v129_v27 = vmul.f32 %v1398_v11, %v1332_v32  ;;  %v1412_v48 = vpop.eup %1092  ;;  %v154_v59 = vand.u32 2147483648, %v1357_v44  ;;  %vm1486_vm2 = vmor %vm118_vm3, %vm119_vm13 }
  0x19   :  { %v86_v14 = vmul.f32 %v1368_v51, %v85_v62  ;;  %v115_v43 = vsub.f32 1.0, %v114_v19  ;;  %v110_v19 = vor.u32 1.1754944e-38, %v109_v8  ;;  %v144_v8 = vmul.f32 %v1412_v48, %v1357_v44  ;;  %v1479_v42 = vpop.eup %1094 }
  0x1a   :  { %v101_v31 = vmul.f32 %v1380_v58, %v100_v15  ;;  %v130_v52 = vsub.f32 1.0, %v129_v27  ;;  %v72_v62 = vadd.f32 %v1362_v47, %v71_v13  ;;  %vm148_vm14 = vweird.f32 %v1357_v44 }
  0x1b   :  { %v87_v15 = vadd.f32 %v1368_v51, %v86_v14  ;;  %v116_v14 = vmul.f32 %v1392_v6, %v115_v43  ;;  %vm1459_vm0 = vcmp.eq.f32.partialorder %v122_v10, 8.507059e+37  ;;  %vm134_vm1 = vweird.f32 %v1398_v11 }
  0x1c   :  { %v131_v55 = vmul.f32 %v1398_v11, %v130_v52  ;;  %v102_v49 = vadd.f32 %v1380_v58, %v101_v31  ;;  %vm1464_vm4 = vcmp.eq.f32.partialorder %v137_v56, 8.507059e+37  ;;  %v145_v31 = vsub.f32 1.0, %v144_v8 }
  0x1d   :  { %v1469_v52 = vor.u32 1.1754944e-38, %v154_v59  ;;  %v76_v26 = vsel %vm1420_vm7, %v1362_v47, %v72_v62  ;;  %v91_v10 = vsel %vm1434_vm10, %v1368_v51, %v87_v15  ;;  %v223_v56 = vand.u32 2147483647, %v1341_v35  ;;  %vm1500_vm7 = vmor %vm133_vm5, %vm134_vm1 }
  0x1e   :  { %v117_v8 = vadd.f32 %v1392_v6, %v116_v14  ;;  %v132_v47 = vadd.f32 %v1398_v11, %v131_v55  ;;  %vm149_vm6 = vweird.f32 %v1412_v48  ;;  %v224_v51 = vand.u32 2147483647, %v1345_v36 }
  0x1f   :  { %v106_v62 = vsel %vm1455_vm15, %v1380_v58, %v102_v49  ;;  %v146_v5 = vmul.f32 %v1412_v48, %v145_v31  ;;  %v159_v15 = vmul.f32 %v1479_v42, %v1386_v61  ;;  %v225_v13 = vand.u32 2147483647, %v1348_v37  ;;  %vm1527_vm3 = vmor %vm148_vm14, %vm149_vm6 }
  0x20   :  { %v169_v14 = vand.u32 2147483648, %v1386_v61  ;;  %v226_v55 = vand.u32 2147483647, %v1351_v38  ;;  %v228_v49 = vsub.f32 0.0, %v220_v53  ;;  %v229_v32 = vsub.f32 0.0, %v221_v54 }
  0x21   :  { %v160_v58 = vsub.f32 1.0, %v159_v15  ;;  %v230_v23 = vsub.f32 0.0, %v222_v46  ;;  %v231_v45 = vsub.f32 0.0, %v223_v56  ;;  %v232_v41 = vsub.f32 0.0, %v224_v51  ;;  %v1546_v51 = vld [vmem:[%s2349_s2] sm:$0xff] }
  0x22   :  { %v121_v31 = vsel %vm1486_vm2, %v1392_v6, %v117_v8  ;;  %v136_v40 = vsel %vm1500_vm7, %v1398_v11, %v132_v47  ;;  %v233_v39 = vsub.f32 0.0, %v225_v13  ;;  %v236_v28 = vmul.f32 1.442695, %v228_v49 }
  0x23   :  { %v1521_v25 = vadd.f32 %v1412_v48, %v146_v5  ;;  %v234_v53 = vsub.f32 0.0, %v226_v55  ;;  %v238_v24 = vmul.f32 1.442695, %v229_v32  ;;  %v240_v54 = vmul.f32 1.442695, %v230_v23 }
  0x24   :  { %v161_v6 = vmul.f32 %v1479_v42, %v160_v58  ;;  %1096 = vpow2.f32 %v236_v28  ;;  %v242_v11 = vmul.f32 1.442695, %v231_v45  ;;  %v244_v56 = vmul.f32 1.442695, %v232_v41 }
  0x25   :  { %v1535_v8 = vsel %vm1426_vm9, %v1382_v60, %v76_v26  ;;  %v1540_v59 = vsel %vm1438_vm11, %v1388_v63, %v91_v10  ;;  %v167_v47 = vand.u32 2147483647, %v1386_v61  ;;  %1098 = vpow2.f32 %v238_v24 }
  0x26   :  { %v1550_v28 = vsel %vm1447_vm12, %v110_v19, %v106_v62  ;;  %v1552_v41 = vor.u32 1.1754944e-38, %v169_v14  ;;  %1100 = vpow2.f32 %v240_v54  ;;  %v246_v60 = vmul.f32 1.442695, %v233_v39 }
  0x27   :  { %2405 = vst [vmem:[#allocation11_spill] sm:$0xff] %v1550_v28  ;;  %v1556_v63 = vsel %vm1459_vm0, %v125_v50, %v121_v31  ;;  %v1560_v24 = vsel %vm1464_vm4, %v140_v57, %v136_v40  ;;  %1102 = vpow2.f32 %v242_v11  ;;  %v1567_v19 = vadd.f32 %v1479_v42, %v161_v6 }
  0x28   :  { %2406 = vst [vmem:[#allocation12_spill] sm:$0xff] %v1556_v63  ;;  %1104 = vpow2.f32 %v244_v56  ;;  %v248_v18 = vmul.f32 1.442695, %v234_v53  ;;  %v350_v39 = vrot.slane %v1546_v51, 7  ;;  %vm204_vm5 = vcmp.ne.f32.partialorder %v1330_v30, %v1330_v30 }
  0x29   :  { %2407 = vst [vmem:[#allocation13_spill] sm:$0xff] %v1560_v24  ;;  %1106 = vpow2.f32 %v246_v60  ;;  %vm205_vm9 = vcmp.ne.f32.partialorder %v1335_v33, %v1335_v33  ;;  %vm206_vm10 = vcmp.ne.f32.partialorder %v1338_v34, %v1338_v34  ;;  %vm207_vm12 = vcmp.ne.f32.partialorder %v1341_v35, %v1341_v35 }
  0x2a   :  { %v1097_v43 = vpop.eup %1096  ;;  %1108 = vpow2.f32 %v248_v18  ;;  %vm208_vm14 = vcmp.ne.f32.partialorder %v1345_v36, %v1345_v36  ;;  %vm209_vm1 = vcmp.ne.f32.partialorder %v1348_v37, %v1348_v37  ;;  %vm163_vm4 = vweird.f32 %v1386_v61 }
  0x2b   :  { %v1099_v10 = vpop.eup %1098  ;;  %v252_v62 = vadd.f32 1.0, %v1097_v43  ;;  %v255_v29 = vmul.f32 -0.5, %v1097_v43  ;;  %v258_v5 = vand.u32 2147483647, %v1097_v43  ;;  %vm164_vm2 = vweird.f32 %v1479_v42 }
  0x2c   :  { %v1101_v13 = vpop.eup %1100  ;;  %v261_v14 = vadd.f32 1.0, %v1099_v10  ;;  %v264_v55 = vmul.f32 -0.5, %v1099_v10  ;;  %v267_v49 = vand.u32 2147483647, %v1099_v10  ;;  %vm210_vm6 = vcmp.ne.f32.partialorder %v1351_v38, %v1351_v38 }
  0x2d   :  { %v1103_v32 = vpop.eup %1102  ;;  %1110 = vlog2.f32 %v252_v62  ;;  %v256_v58 = vadd.f32 1.0, %v255_v29  ;;  %v270_v23 = vadd.f32 1.0, %v1101_v13  ;;  %v273_v6 = vmul.f32 -0.5, %v1101_v13 }
  0x2e   :  { %v1105_v53 = vpop.eup %1104  ;;  %1112 = vlog2.f32 %v261_v14  ;;  %v265_v54 = vadd.f32 1.0, %v264_v55  ;;  %vm1582_vm8 = vcmp.lt.f32.partialorder %v258_v5, 0.0004427343  ;;  %v276_v60 = vand.u32 2147483647, %v1101_v13 }
  0x2f   :  { %1114 = vlog2.f32 %v270_v23  ;;  %v279_v18 = vadd.f32 1.0, %v1103_v32  ;;  %v1107_v62 = vpop.eup %1106  ;;  %vm1590_vm11 = vcmp.lt.f32.partialorder %v267_v49, 0.0004427343  ;;  %v274_v14 = vadd.f32 1.0, %v273_v6 }
  0x30   :  { %v282_v55 = vmul.f32 -0.5, %v1103_v32  ;;  %v285_v5 = vand.u32 2147483647, %v1103_v32  ;;  %v257_v27 = vmul.f32 %v1097_v43, %v256_v58  ;;  %v288_v7 = vadd.f32 1.0, %v1105_v53  ;;  %v1109_v11 = vpop.eup %1108 }
  0x31   :  { %1116 = vlog2.f32 %v279_v18  ;;  %v291_v23 = vmul.f32 -0.5, %v1105_v53  ;;  %v266_v57 = vmul.f32 %v1099_v10, %v265_v54  ;;  %vm1596_vm13 = vcmp.lt.f32.partialorder %v276_v60, 0.0004427343 }
  0x32   :  { %v283_v49 = vadd.f32 1.0, %v282_v55  ;;  %v294_v40 = vand.u32 2147483647, %v1105_v53  ;;  %1118 = vlog2.f32 %v288_v7  ;;  %v297_v26 = vadd.f32 1.0, %v1107_v62 }
  0x33   :  { %v1111_v15 = vpop.eup %1110  ;;  %v292_v6 = vadd.f32 1.0, %v291_v23  ;;  %v300_v45 = vmul.f32 -0.5, %v1107_v62  ;;  %v275_v18 = vmul.f32 %v1101_v13, %v274_v14  ;;  %vm1602_vm15 = vcmp.lt.f32.partialorder %v285_v5, 0.0004427343 }
  0x34   :  { %v1113_v43 = vpop.eup %1112  ;;  %v254_v58 = vmul.f32 0.6931472, %v1111_v15  ;;  %v284_v22 = vmul.f32 %v1103_v32, %v283_v49  ;;  %vm1606_vm0 = vcmp.lt.f32.partialorder %v294_v40, 0.0004427343  ;;  %1120 = vlog2.f32 %v297_v26 }
  0x35   :  { %v1115_v54 = vpop.eup %1114  ;;  %v263_v60 = vmul.f32 0.6931472, %v1113_v43  ;;  %v303_v7 = vand.u32 2147483647, %v1107_v62  ;;  %v301_v32 = vadd.f32 1.0, %v300_v45  ;;  %v306_v14 = vadd.f32 1.0, %v1109_v11 }
  0x36   :  { %v260_v15 = vsel %vm1582_vm8, %v257_v27, %v254_v58  ;;  %v272_v13 = vmul.f32 0.6931472, %v1115_v54  ;;  %v293_v49 = vmul.f32 %v1105_v53, %v292_v6  ;;  %v309_v40 = vmul.f32 -0.5, %v1109_v11 }
  0x37   :  { %v1117_v5 = vpop.eup %1116  ;;  %v269_v23 = vsel %vm1590_vm11, %v266_v57, %v263_v60  ;;  %v312_v43 = vand.u32 2147483647, %v1109_v11  ;;  %1122 = vlog2.f32 %v306_v14  ;;  %v2418_v27 = vmax.f32 %v1330_v30, 0.0 }
  0x38   :  { %v278_v26 = vsel %vm1596_vm13, %v275_v18, %v272_v13  ;;  %v281_v50 = vmul.f32 0.6931472, %v1117_v5  ;;  %v1119_v56 = vpop.eup %1118  ;;  %vm1624_vm7 = vcmp.lt.f32.partialorder %v303_v7, 0.0004427343  ;;  %v310_v53 = vadd.f32 1.0, %v309_v40 }
  0x39   :  { %v324_v45 = vadd.f32 %v260_v15, %v2418_v27  ;;  %v2421_v29 = vmax.f32 %v1335_v33, 0.0  ;;  %v2422_v31 = vmax.f32 %v1338_v34, 0.0  ;;  %v290_v54 = vmul.f32 0.6931472, %v1119_v56 }
  0x3a   :  { %v287_v18 = vsel %vm1602_vm15, %v284_v22, %v281_v50  ;;  %v302_v60 = vmul.f32 %v1107_v62, %v301_v32  ;;  %v1121_v15 = vpop.eup %1120  ;;  %vm1638_vm8 = vcmp.lt.f32.partialorder %v312_v43, 0.0004427343  ;;  %v2425_v14 = vmax.f32 %v1341_v35, 0.0 }
  0x3b   :  { %v325_v6 = vadd.f32 %v269_v23, %v2421_v29  ;;  %v326_v58 = vadd.f32 %v278_v26, %v2422_v31  ;;  %v332_v7 = vsel %vm204_vm5, %v1330_v30, %v324_v45  ;;  %v296_v30 = vsel %vm1606_vm0, %v293_v49, %v290_v54 }
  0x3c   :  { %v327_v5 = vadd.f32 %v287_v18, %v2425_v14  ;;  %v299_v62 = vmul.f32 0.6931472, %v1121_v15  ;;  %v340_v10 = vsub.f32 0.0, %v332_v7  ;;  %v2426_v23 = vand.u32 2147483647, %v1357_v44 }
  0x3d   :  { %v333_v50 = vsel %vm205_vm9, %v1335_v33, %v325_v6  ;;  %v334_v22 = vsel %vm206_vm10, %v1338_v34, %v326_v58  ;;  %v311_v43 = vmul.f32 %v1109_v11, %v310_v53  ;;  %v2429_v33 = vmax.f32 %v1345_v36, 0.0  ;;  %v1123_v49 = vpop.eup %1122  ;;  %vm1718_vm10 = vmor %vm163_vm4, %vm164_vm2 }
  0x3e   :  { %v341_v32 = vsub.f32 0.0, %v333_v50  ;;  %vm1656_vm5 = vcmp.eq.f32.partialorder %v2426_v23, 8.507059e+37  ;;  %v335_v34 = vsel %vm207_vm12, %v1341_v35, %v327_v5  ;;  %v342_v55 = vsub.f32 0.0, %v334_v22 }
  0x3f   :  { %v328_v26 = vadd.f32 %v296_v30, %v2429_v33  ;;  %vm1668_vm9 = vcmp.eq.f32.partialorder %v167_v47, 8.507059e+37  ;;  %v305_v44 = vsel %vm1624_vm7, %v302_v60, %v299_v62  ;;  %v343_v11 = vsub.f32 0.0, %v335_v34 }
  0x40   :  { %v365_v45 = vadd.f32 %v350_v39, %v340_v10  ;;  %v366_v56 = vadd.f32 %v1546_v51, %v341_v32  ;;  %v308_v53 = vmul.f32 0.6931472, %v1123_v49  ;;  %v2432_v35 = vmax.f32 %v1348_v37, 0.0 }
  0x41   :  { %v336_v47 = vsel %vm208_vm14, %v1345_v36, %v328_v26  ;;  %v2433_v6 = vrot.slane %v1546_v51, 1  ;;  %v2434_v58 = vrot.slane %v1546_v51, 2  ;;  %v2435_v39 = vrot.slane %v1259_v0, 7 }
  0x42   :  { %v329_v29 = vadd.f32 %v305_v44, %v2432_v35  ;;  %v344_v57 = vsub.f32 0.0, %v336_v47  ;;  %v2436_v60 = vrot.slane %v1264_v1, 7  ;;  %v314_v15 = vsel %vm1638_vm8, %v311_v43, %v308_v53 }
  0x43   :  { %v367_v31 = vadd.f32 %v2433_v6, %v342_v55  ;;  %v368_v18 = vadd.f32 %v2434_v58, %v343_v11  ;;  %v1689_v54 = vmax.f32 %v365_v45, %v2435_v39  ;;  %v2358_v14 = vrot.slane %v1288_v9, 7 }
  0x44   :  { %v1693_v7 = vmax.f32 %v366_v56, %v2436_v60  ;;  %v337_v36 = vsel %vm209_vm1, %v1348_v37, %v329_v29  ;;  %v2437_v5 = vrot.slane %v1269_v2, 7  ;;  %v2438_v22 = vmax.f32 %v1351_v38, 0.0 }
  0x45   :  { %v345_v62 = vsub.f32 0.0, %v337_v36  ;;  %v2439_v10 = vrot.slane %v1546_v51, 3  ;;  %v2440_v13 = vrot.slane %v1274_v3, 7  ;;  %v2357_v43 = vrot.slane %v1295_v12, 7 }
  0x46   :  { %v1704_v50 = vmax.f32 %v367_v31, %v2437_v5  ;;  %v330_v30 = vadd.f32 %v314_v15, %v2438_v22  ;;  %v413_v33 = vrot.slane %v1689_v54, 1  ;;  %v414_v26 = vrot.slane %v1693_v7, 1 }
  0x47   :  { %v369_v32 = vadd.f32 %v2439_v10, %v344_v57  ;;  %v1712_v23 = vmax.f32 %v368_v18, %v2440_v13  ;;  %v2443_v49 = vrot.slane %v1546_v51, 4  ;;  %v2444_v44 = vrot.slane %v1279_v4, 7  ;;  %v1753_v57 = vld [vmem:[%s2348_s1] sm:$0xff] }
  0x48   :  { %v415_v34 = vrot.slane %v1704_v50, 1  ;;  %v338_v55 = vsel %vm210_vm6, %v1351_v38, %v330_v30  ;;  %v429_v53 = vsub.f32 %v1259_v0, %v413_v33  ;;  %v430_v35 = vsub.f32 %v1264_v1, %v414_v26 }
  0x49   :  { %v370_v61 = vadd.f32 %v2443_v49, %v345_v62  ;;  %v1734_v11 = vmax.f32 %v369_v32, %v2444_v44  ;;  %v416_v45 = vrot.slane %v1712_v23, 1  ;;  %v346_v56 = vsub.f32 0.0, %v338_v55 }
  0x4a   :  { %v431_v29 = vsub.f32 %v1269_v2, %v415_v34  ;;  %v166_v38 = vsel %vm1718_vm10, %v1479_v42, %v1567_v19  ;;  %v2445_v58 = vrot.slane %v1546_v51, 5  ;;  %v437_v39 = vmul.f32 1.442695, %v429_v53 }
  0x4b   :  { %v1746_v47 = vmax.f32 %v370_v61, %v2358_v14  ;;  %v417_v6 = vrot.slane %v1734_v11, 1  ;;  %v432_v31 = vsub.f32 %v1274_v3, %v416_v45  ;;  %v439_v60 = vmul.f32 1.442695, %v430_v35 }
  0x4c   :  { %v371_v18 = vadd.f32 %v2445_v58, %v346_v56  ;;  %v441_v15 = vmul.f32 1.442695, %v431_v29  ;;  %v2446_v42 = vsel %vm1527_vm3, %v1412_v48, %v1521_v25  ;;  %v1772_v30 = vsel %vm1668_vm9, %v1552_v41, %v166_v38 }
  0x4d   :  { %v1765_v19 = vsel %vm1656_vm5, %v1469_v52, %v2446_v42  ;;  %v418_v36 = vrot.slane %v1746_v47, 1  ;;  %v433_v5 = vsub.f32 %v1279_v4, %v417_v6  ;;  %v443_v22 = vmul.f32 1.442695, %v432_v31  ;;  %v2448_v6 = vld [vmem:[#allocation8_spill] sm:$0xff] }
  0x4e   :  { %2447 = vst [vmem:[#allocation14_spill] sm:$0xff] %v1765_v19  ;;  %v1776_v46 = vmax.f32 %v371_v18, %v2357_v43  ;;  %1124 = vpow2.f32 %v437_v39  ;;  %v479_v25 = vrot.slane %v1753_v57, 7  ;;  %v480_v40 = vrot.slane %v1753_v57, 1 }
  0x4f   :  { %v434_v48 = vsub.f32 %v1288_v9, %v418_v36  ;;  %1126 = vpow2.f32 %v439_v60  ;;  %v445_v52 = vmul.f32 1.442695, %v433_v5  ;;  %v481_v27 = vrot.slane %v1753_v57, 2  ;;  %v2449_v60 = vld [vmem:[#allocation9_spill] sm:$0xff]  ;;  %v2451_v5 = vld [vmem:[#allocation10_spill] sm:$0xff] }
  0x50   :  { %v419_v62 = vrot.slane %v1776_v46, 1  ;;  %1128 = vpow2.f32 %v441_v15  ;;  %v482_v41 = vrot.slane %v1753_v57, 3  ;;  %v483_v32 = vrot.slane %v1753_v57, 4 }
  0x51   :  { %1130 = vpow2.f32 %v443_v22  ;;  %v447_v10 = vmul.f32 1.442695, %v434_v48  ;;  %v484_v13 = vrot.slane %v1753_v57, 5  ;;  %v510_v33 = vrot.slane %v1299_v16, 4 }
  0x52   :  { %v435_v37 = vsub.f32 %v1295_v12, %v419_v62  ;;  %1132 = vpow2.f32 %v445_v52  ;;  %v511_v26 = vrot.slane %v1302_v17, 4  ;;  %v494_v34 = vmul.f32 %v479_v25, %v1535_v8 }
  0x53   :  { %1134 = vpow2.f32 %v447_v10  ;;  %v495_v55 = vmul.f32 %v1753_v57, %v1540_v59  ;;  %v512_v49 = vrot.slane %v1307_v20, 4  ;;  %v496_v45 = vmul.f32 %v480_v40, %v1550_v28 }
  0x54   :  { %v1793_v61 = vpop.eup %1124  ;;  %v449_v44 = vmul.f32 1.442695, %v435_v37  ;;  %v497_v56 = vmul.f32 %v481_v27, %v1556_v63  ;;  %v513_v53 = vrot.slane %v1310_v21, 4  ;;  %v498_v29 = vmul.f32 %v482_v41, %v1560_v24 }
  0x55   :  { %v1798_v35 = vpop.eup %1126  ;;  %v499_v38 = vmul.f32 %v483_v32, %v1765_v19  ;;  %v514_v31 = vrot.slane %v2448_v6, 4  ;;  %v526_v58 = vmul.f32 %v1793_v61, %v510_v33  ;;  %v500_v39 = vmul.f32 %v484_v13, %v1772_v30 }
  0x56   :  { %v1804_v18 = vpop.eup %1128  ;;  %1136 = vpow2.f32 %v449_v44  ;;  %v515_v15 = vrot.slane %v2449_v60, 4  ;;  %v527_v42 = vmul.f32 %v1798_v35, %v511_v26  ;;  %v516_v22 = vrot.slane %v2451_v5, 4 }
  0x57   :  { %v1809_v36 = vpop.eup %1130  ;;  %v528_v25 = vmul.f32 %v1804_v18, %v512_v49  ;;  %v542_v48 = vrot.slane %v526_v58, 7  ;;  %v566_v52 = vrot.slane %v1259_v0, 2  ;;  %v567_v41 = vrot.slane %v1264_v1, 2 }
  0x58   :  { %2450 = vst [vmem:[#allocation8_spill] sm:$0xff] %v1809_v36  ;;  %v1814_v40 = vpop.eup %1132  ;;  %v529_v62 = vmul.f32 %v1809_v36, %v513_v53  ;;  %v543_v27 = vrot.slane %v527_v42, 7  ;;  %v568_v10 = vrot.slane %v1269_v2, 2  ;;  %v569_v26 = vrot.slane %v1274_v3, 2 }
  0x59   :  { %v1819_v32 = vpop.eup %1134  ;;  %v530_v13 = vmul.f32 %v1814_v40, %v514_v31  ;;  %v544_v37 = vrot.slane %v528_v25, 7  ;;  %v1822_v33 = vadd.f32 %v542_v48, %v494_v34  ;;  %v570_v53 = vrot.slane %v1279_v4, 2 }
  0x5a   :  { %v531_v49 = vmul.f32 %v1819_v32, %v515_v15  ;;  %v545_v44 = vrot.slane %v529_v62, 7  ;;  %v1826_v58 = vadd.f32 %v543_v27, %v495_v55  ;;  %v571_v14 = vrot.slane %v1288_v9, 2 }
  0x5b   :  { %2452 = vst [vmem:[#allocation9_spill] sm:$0xff] %v1822_v33  ;;  %v546_v42 = vrot.slane %v530_v13, 7  ;;  %v1829_v43 = vadd.f32 %v544_v37, %v496_v45  ;;  %v572_v36 = vrot.slane %v1295_v12, 2  ;;  %v582_v48 = vmul.f32 %v566_v52, %v1822_v33 }
  0x5c   :  { %2453 = vst [vmem:[#allocation10_spill] sm:$0xff] %v1826_v58  ;;  %v1833_v31 = vpop.eup %1136  ;;  %v547_v34 = vrot.slane %v531_v49, 7  ;;  %v1835_v25 = vadd.f32 %v545_v44, %v497_v56  ;;  %v583_v15 = vmul.f32 %v567_v41, %v1826_v58  ;;  %vm2374_vm3 = vcmask 1042434  }
  0x5d   :  { %2454 = vst [vmem:[#allocation15_spill] sm:$0xff] %v1829_v43  ;;  %v532_v55 = vmul.f32 %v1833_v31, %v516_v22  ;;  %v1840_v62 = vadd.f32 %v546_v42, %v498_v29  ;;  %v584_v45 = vmul.f32 %v568_v10, %v1829_v43  ;;  %vm2371_vm11 = vcmask 1043459  }
  0x5e   :  { %2455 = vst [vmem:[#allocation16_spill] sm:$0xff] %v1835_v25  ;;  %v1843_v27 = vadd.f32 %v547_v34, %v499_v38  ;;  %v585_v13 = vmul.f32 %v569_v26, %v1835_v25  ;;  %v598_v37 = vrot.slane %v583_v15, 7  ;;  %vm2367_vm12 = vcmask 1044484  }
  0x5f   :  { %2456 = vst [vmem:[#allocation17_spill] sm:$0xff] %v1840_v62  ;;  %v548_v49 = vrot.slane %v532_v55, 7  ;;  %v586_v56 = vmul.f32 %v570_v53, %v1840_v62  ;;  %v601_v44 = vrot.slane %v584_v45, 6  ;;  %vm2364_vm13 = vcmask 1045509   ;;  %v1862_v45 = vld [vmem:[%s2347_s0 + $0x38] sm:$0x3f] }
  0x60   :  { %2457 = vst [vmem:[#allocation18_spill] sm:$0xff] %v1843_v27  ;;  %v587_v52 = vmul.f32 %v571_v14, %v1843_v27  ;;  %v600_v22 = vsel %vm2374_vm3, %v598_v37, %v582_v48  ;;  %v604_v29 = vrot.slane %v585_v13, 5  ;;  %vm2363_vm14 = vcmask 1046534  }
  0x61   :  { %v1849_v41 = vadd.f32 %v548_v49, %v500_v39  ;;  %v603_v38 = vsel %vm2371_vm11, %v601_v44, %v600_v22  ;;  %v607_v10 = vrot.slane %v586_v56, 4  ;;  %vm2362_vm15 = vcmask 1047559  }
  0x62   :  { %v606_v26 = vsel %vm2367_vm12, %v604_v29, %v603_v38  ;;  %v610_v42 = vrot.slane %v587_v52, 3  ;;  %vm2360_vm0 = vcmask 261121   ;;  %v948_v48 = vrot.slane %v1693_v7, 7 }
  0x63   :  { %2458 = vst [vmem:[#allocation19_spill] sm:$0xff] %v1849_v41  ;;  %v588_v34 = vmul.f32 %v572_v36, %v1849_v41  ;;  %v609_v53 = vsel %vm2364_vm13, %v607_v10, %v606_v26  ;;  %v950_v39 = vrot.slane %v1704_v50, 6  ;;  %v952_v55 = vrot.slane %v1712_v23, 5 }
  0x64   :  { %v612_v15 = vsel %vm2363_vm14, %v610_v42, %v609_v53  ;;  %v954_v36 = vrot.slane %v1734_v11, 4  ;;  %vm963_vm1 = vcmask 258052   ;;  %v949_v37 = vsel %vm2374_vm3, %v948_v48, %v1689_v54 }
  0x65   :  { %v613_v14 = vrot.slane %v588_v34, 2  ;;  %v956_v49 = vrot.slane %v1746_v47, 3  ;;  %964 = vst.msk [vmem:[%s2351_s4 - $0x4] sm:$0x10] %vm963_vm1, %v1299_v16  ;;  %v951_v50 = vsel %vm2371_vm11, %v950_v39, %v949_v37  ;;  %v958_v23 = vrot.slane %v1776_v46, 2 }
  0x66   :  { %965 = vst.msk [vmem:[%s2351_s4 - $0x2] sm:$0x10] %vm963_vm1, %v1302_v17  ;;  %v1883_v54 = vsub.f32 0.0, %v1862_v45  ;;  %v953_v11 = vsel %vm2367_vm12, %v952_v55, %v951_v50  ;;  %v1062_v47 = vmul.f32 -1.442695, %v1862_v45  ;;  %vm972_vm4 = vcmask 257027  }
  0x67   :  { %v615_v13 = vsel %vm2362_vm15, %v613_v14, %v612_v15  ;;  %966 = vst.msk [vmem:[%s2351_s4] sm:$0x10] %vm963_vm1, %v1307_v20  ;;  %v955_v46 = vsel %vm2364_vm13, %v954_v36, %v953_v11  ;;  %vm981_vm2 = vcmask 254977   ;;  %v1983_v14 = vmul.f32 0.17677669, %v1862_v45 }
  0x68   :  { %v620_v7 = vsel %vm2360_vm0, %v615_v13, 0.0  ;;  %967 = vst.msk [vmem:[%s2351_s4 + $0x2] sm:$0x10] %vm963_vm1, %v1310_v21  ;;  %v227_v56 = vand.u32 2147483647, %v1883_v54  ;;  %v957_v44 = vsel %vm2363_vm14, %v956_v49, %v955_v46  ;;  %1138 = vpow2.f32 %v1062_v47 }
  0x69   :  { %621 = vadd.xlane.f32.xlu0 %v620_v7  ;;  %968 = vst.msk [vmem:[%s2351_s4 + $0x4] sm:$0x10] %vm963_vm1, %v2448_v6  ;;  %v959_v52 = vsel %vm2362_vm15, %v958_v23, %v957_v44  ;;  %v203_v50 = vmax.f32 %v1883_v54, 0.0  ;;  %vm211_vm10 = vcmp.ne.f32.partialorder %v1883_v54, %v1883_v54 }
  0x6a   :  { %969 = vst.msk [vmem:[%s2351_s4 + $0x6] sm:$0x10] %vm963_vm1, %v2449_v60  ;;  %v235_v22 = vsub.f32 0.0, %v227_v56 }
  0x6b   :  { %961 = vst.msk [vmem:[#allocation4 - $0x1] sm:$0xfe] %vm2360_vm0, %v959_v52  ;;  %v356_v52 = vrot.slane %v1546_v51, 6  ;;  %v2462_v51 = vrot.slane %v1274_v3, 7 }
  0x6c   :  { %970 = vst.msk [vmem:[%s2351_s4 + $0x8] sm:$0x10] %vm963_vm1, %v2451_v5  ;;  %v250_v29 = vmul.f32 1.442695, %v235_v22 }
  0x6d   :  { %973 = vst.msk [vmem:[%s2351_s4 - $0x2] sm:$0x8] %vm972_vm4, %v1259_v0 }
  0x6e   :  { %974 = vst.msk [vmem:[%s2351_s4] sm:$0x8] %vm972_vm4, %v1264_v1  ;;  %1140 = vpow2.f32 %v250_v29  ;;  %v1139_v38 = vpop.eup %1138  ;;  %v2459_v29 = vrot.slane %v1259_v0, 7 }
  0x6f   :  { %975 = vst.msk [vmem:[%s2351_s4 + $0x2] sm:$0x8] %vm972_vm4, %v1269_v2  ;;  %v67_v10 = vadd.f32 1.0, %v1139_v38 }
  0x70   :  { %976 = vst.msk [vmem:[%s2351_s4 + $0x4] sm:$0x8] %vm972_vm4, %v1274_v3  ;;  %v631_v38 = vmul.f32 %v2459_v29, %v1299_v16  ;;  %v634_v16 = vmul.f32 %v2462_v51, %v1310_v21  ;;  %v2465_v21 = vrot.slane %v1295_v12, 7 }
  0x71   :  { %977 = vst.msk [vmem:[%s2351_s4 + $0x6] sm:$0x8] %vm972_vm4, %v1279_v4  ;;  %1142 = vrcp.f32 %v67_v10  ;;  %v184_v55 = vand.u32 2147483648, %v67_v10  ;;  %vm178_vm6 = vweird.f32 %v67_v10  ;;  %v182_v13 = vand.u32 2147483647, %v67_v10 }
  0x72   :  { %978 = vst.msk [vmem:[%s2351_s4 + $0x8] sm:$0x8] %vm972_vm4, %v1288_v9 }
  0x73   :  { %979 = vst.msk [vmem:[%s2351_s4 + $0xa] sm:$0x8] %vm972_vm4, %v1295_v12  ;;  %v185_v23 = vor.u32 1.1754944e-38, %v184_v55  ;;  %vm183_vm9 = vcmp.eq.f32.partialorder %v182_v13, 8.507059e+37  ;;  %v651_v55 = vrot.slane %v634_v16, 5 }
  0x74   :  { %v1141_v26 = vpop.eup %1140  ;;  %982 = vst.msk [vmem:[%s2350_s3 - $0x1] sm:$0x2] %vm981_vm2, %v1535_v8 }
  0x75   :  { %983 = vst.msk [vmem:[%s2350_s3 + $0x3] sm:$0x2] %vm981_vm2, %v1540_v59  ;;  %v315_v42 = vadd.f32 1.0, %v1141_v26  ;;  %v318_v34 = vmul.f32 -0.5, %v1141_v26  ;;  %v321_v39 = vand.u32 2147483647, %v1141_v26 }
  0x76   :  { %984 = vst.msk [vmem:[%s2350_s3 + $0x7] sm:$0x2] %vm981_vm2, %v1550_v28 }
  0x77   :  { %985 = vst.msk [vmem:[%s2350_s3 + $0xb] sm:$0x2] %vm981_vm2, %v1556_v63  ;;  %1144 = vlog2.f32 %v315_v42  ;;  %v1143_v53 = vpop.eup %1142  ;;  %v319_v15 = vadd.f32 1.0, %v318_v34  ;;  %vm322_vm8 = vcmp.lt.f32.partialorder %v321_v39, 0.0004427343  ;;  %v2461_v42 = vrot.slane %v1269_v2, 7 }
  0x78   :  { %986 = vst.msk [vmem:[%s2350_s3 + $0xf] sm:$0x2] %vm981_vm2, %v1560_v24  ;;  %v174_v48 = vmul.f32 %v1143_v53, %v67_v10  ;;  %vm179_vm7 = vweird.f32 %v1143_v53  ;;  %v2460_v10 = vrot.slane %v1264_v1, 7 }
  0x79   :  { %987 = vst.msk [vmem:[%s2350_s3 + $0x13] sm:$0x2] %vm981_vm2, %v1765_v19  ;;  %v320_v37 = vmul.f32 %v1141_v26, %v319_v15  ;;  %vm180_vm5 = vmor %vm178_vm6, %vm179_vm7  ;;  %v633_v34 = vmul.f32 %v2461_v42, %v1307_v20  ;;  %v2463_v20 = vrot.slane %v1279_v4, 7  ;;  %vm667_vm6 = vcmask 257024  }
  0x7a   :  { %988 = vst.msk [vmem:[%s2350_s3 + $0x17] sm:$0x2] %vm981_vm2, %v1772_v30  ;;  %v175_v36 = vsub.f32 1.0, %v174_v48  ;;  %v632_v26 = vmul.f32 %v2460_v10, %v1302_v17  ;;  %v388_v48 = vrot.slane %v1862_v45, 7 }
  0x7b   :  { %971 = vst.msk [vmem:[%s2351_s4 + $0xa] sm:$0x10] %vm963_vm1, %v1983_v14  ;;  %v649_v39 = vrot.slane %v633_v34, 6  ;;  %vm663_vm1 = vcmask 261124   ;;  %v485_v34 = vrot.slane %v1753_v57, 6 }
  0x7c   :  { %980 = vst.msk [vmem:[%s2351_s4 + $0xc] sm:$0x8] %vm972_vm4, %v1862_v45  ;;  %v176_v7 = vmul.f32 %v1143_v53, %v175_v36  ;;  %v647_v17 = vrot.slane %v632_v26, 7  ;;  %v2464_v36 = vrot.slane %v1288_v9, 7  ;;  %vm655_vm4 = vcmask 1041409  }
  0x7d   :  { %v1145_v49 = vpop.eup %1144 }
  0x7e   :  { %v317_v11 = vmul.f32 0.6931472, %v1145_v49  ;;  %v177_v47 = vadd.f32 %v1143_v53, %v176_v7  ;;  %v636_v13 = vmul.f32 %v2464_v36, %v2449_v60  ;;  %v648_v49 = vsel %vm2364_vm13, %v647_v17, %v631_v38 }
  0x7f   :  { %v637_v7 = vmul.f32 %v2465_v21, %v2451_v5  ;;  %v573_v17 = vrot.slane %v1862_v45, 2 }
  0x80   :  { %v323_v46 = vsel %vm322_vm8, %v320_v37, %v317_v11  ;;  %v181_v56 = vsel %vm180_vm5, %v1143_v53, %v177_v47  ;;  %v654_v47 = vrot.slane %v636_v13, 3  ;;  %v679_v13 = vrot.slane %v1535_v8, 7 }
  0x81   :  { %v331_v44 = vadd.f32 %v323_v46, %v203_v50  ;;  %v2004_v22 = vsel %vm183_vm9, %v185_v23, %v181_v56  ;;  %v638_v50 = vmul.f32 %v388_v48, %v1983_v14  ;;  %v650_v23 = vsel %vm2363_vm14, %v649_v39, %v648_v49 }
  0x82   :  { %989 = vst.msk [vmem:[%s2350_s3 + $0x1b] sm:$0x2] %vm981_vm2, %v2004_v22  ;;  %v657_v56 = vrot.slane %v637_v7, 2  ;;  %vm2376_vm2 = vcmask 253952   ;;  %v501_v16 = vmul.f32 %v485_v34, %v2004_v22  ;;  %v681_v49 = vrot.slane %v1550_v28, 7 }
  0x83   :  { %v339_v15 = vsel %vm211_vm10, %v1883_v54, %v331_v44  ;;  %v635_v54 = vmul.f32 %v2463_v20, %v2448_v6  ;;  %v652_v6 = vsel %vm2362_vm15, %v651_v55, %v650_v23  ;;  %v659_v44 = vrot.slane %v638_v50, 1 }
  0x84   :  { %v347_v53 = vsub.f32 0.0, %v339_v15  ;;  %v664_v60 = vsel %vm663_vm1, %v652_v6, 0.0  ;;  %v517_v15 = vrot.slane %v1983_v14, 4  ;;  %v682_v23 = vrot.slane %v1556_v63, 7 }
  0x85   :  { %v653_v11 = vrot.slane %v635_v54, 4  ;;  %665 = vadd.xlane.f32.xlu1 %v664_v60  ;;  %v2076_v6 = vmul.f32 %v679_v13, %v1535_v8 }
  0x86   :  { %v372_v37 = vadd.f32 %v356_v52, %v347_v53 }
  0x87   :  { %v656_v52 = vsel %vm655_vm4, %v654_v47, %v653_v11  ;;  %v683_v11 = vrot.slane %v1560_v24, 7 }
  0x88   :  { %v404_v46 = vmax.f32 %v372_v37, %v388_v48  ;;  %v658_v38 = vsel %vm2374_vm3, %v657_v56, %v656_v52  ;;  %v680_v37 = vrot.slane %v1540_v59, 7 }
  0x89   :  { %v660_v10 = vsel %vm2371_vm11, %v659_v44, %v658_v38  ;;  %v2083_v44 = vmul.f32 %v681_v49, %v1550_v28 }
  0x8a   :  { %v420_v29 = vrot.slane %v404_v46, 1  ;;  %v668_v42 = vsel %vm667_vm6, %v660_v10, 0.0  ;;  %v684_v46 = vrot.slane %v1765_v19, 7  ;;  %v2079_v56 = vmul.f32 %v680_v37, %v1540_v59 }
  0x8c   :  { %v436_v5 = vsub.f32 %v1862_v45, %v420_v29  ;;  %962 = vst.msk [vmem:[#allocation4 + $0x7] sm:$0x1] %vm2376_vm2, %v420_v29 }
  0x8d   :  { %669 = vadd.xlane.f32.xlu1 %v668_v42  ;;  %v2098_v42 = vmul.f32 %v683_v11, %v1560_v24  ;;  %1040 = dma.vmem_to_hbm [thread:$0]  %s1036_s22, 128, %s1038_s25, [#allocation5]  }
  0x8e   :  { %v451_v26 = vmul.f32 1.442695, %v436_v5 }
  0x90   :  { %1146 = vpow2.f32 %v451_v26  ;;  %v2095_v26 = vmul.f32 %v682_v23, %v1556_v63 }
  0x96   :  { %v2044_v51 = vpop.eup %1146 }
  0x97   :  { %v533_v53 = vmul.f32 %v2044_v51, %v517_v15 }
  0x99   :  { %v549_v48 = vrot.slane %v533_v53, 7 }
  0x9b   :  { %v2049_v39 = vadd.f32 %v549_v48, %v501_v16  ;;  %v2103_v16 = vmul.f32 %v684_v46, %v1765_v19 }
  0x9d   :  { %2466 = vst [vmem:[#allocation20_spill] sm:$0xff] %v2049_v39  ;;  %v589_v55 = vmul.f32 %v573_v17, %v2049_v39 }
  0x9f   :  { %v616_v20 = vrot.slane %v589_v55, 1 }
  0xa1   :  { %v624_v54 = vsel %vm2376_vm2, %v616_v20, 0.0 }
  0xa2   :  { %625 = vadd.xlane.f32.xlu0 %v624_v54 }
  0xdc   :  { %v622_v57 = vpop.xlane.xlu0 %621 }
  0xdd   :  { %v627_v36 = vand.u32 2147483647, %v622_v57 }
  0xdf   :  { %v2053_v14 = vmax.f32 %v627_v36, 1.0 }
  0xe1   :  { %v2059_v21 = vrot.slane %v2053_v14, 7  ;;  %v2062_v7 = vrot.slane %v2053_v14, 1  ;;  %v2065_v50 = vrot.slane %v2053_v14, 2  ;;  %1148 = vrcp.f32 %v2053_v14 }
  0xe2   :  { %v2071_v47 = vrot.slane %v2053_v14, 3  ;;  %v2086_v60 = vrot.slane %v2053_v14, 4  ;;  %v744_v29 = vand.u32 2147483647, %v2053_v14  ;;  %v746_v5 = vand.u32 2147483648, %v2053_v14 }
  0xe3   :  { %1150 = vrcp.f32 %v2059_v21  ;;  %v731_v52 = vand.u32 2147483648, %v2059_v21  ;;  %v729_v38 = vand.u32 2147483647, %v2059_v21  ;;  %v761_v10 = vand.u32 2147483648, %v2062_v7 }
  0xe4   :  { %1152 = vrcp.f32 %v2062_v7  ;;  %v759_v34 = vand.u32 2147483647, %v2062_v7  ;;  %vm725_vm7 = vweird.f32 %v2059_v21  ;;  %vm740_vm8 = vweird.f32 %v2053_v14 }
  0xe5   :  { %1154 = vrcp.f32 %v2065_v50  ;;  %v776_v53 = vand.u32 2147483648, %v2065_v50  ;;  %v732_v17 = vor.u32 1.1754944e-38, %v731_v52  ;;  %vm2109_vm5 = vcmp.eq.f32.partialorder %v744_v29, 8.507059e+37 }
  0xe6   :  { %1156 = vrcp.f32 %v2071_v47  ;;  %vm755_vm9 = vweird.f32 %v2062_v7  ;;  %v774_v54 = vand.u32 2147483647, %v2065_v50  ;;  %vm2117_vm1 = vcmp.eq.f32.partialorder %v729_v38, 8.507059e+37 }
  0xe7   :  { %v1149_v15 = vpop.eup %1148  ;;  %1158 = vrcp.f32 %v2086_v60  ;;  %v747_v37 = vor.u32 1.1754944e-38, %v746_v5  ;;  %v762_v49 = vor.u32 1.1754944e-38, %v761_v10  ;;  %v789_v23 = vand.u32 2147483647, %v2071_v47 }
  0xe8   :  { %v736_v55 = vmul.f32 %v1149_v15, %v2053_v14  ;;  %vm741_vm4 = vweird.f32 %v1149_v15  ;;  %vm2123_vm6 = vcmp.eq.f32.partialorder %v759_v34, 8.507059e+37  ;;  %v791_v29 = vand.u32 2147483648, %v2071_v47 }
  0xe9   :  { %v1151_v48 = vpop.eup %1150  ;;  %v777_v5 = vor.u32 1.1754944e-38, %v776_v53  ;;  %vm2131_vm12 = vcmp.eq.f32.partialorder %v774_v54, 8.507059e+37  ;;  %v804_v41 = vand.u32 2147483647, %v2086_v60  ;;  %vm2137_vm11 = vcmp.eq.f32.partialorder %v789_v23, 8.507059e+37  ;;  %vm742_vm2 = vmor %vm740_vm8, %vm741_vm4 }
  0xea   :  { %v1153_v57 = vpop.eup %1152  ;;  %v721_v36 = vmul.f32 %v1151_v48, %v2059_v21  ;;  %v737_v11 = vsub.f32 1.0, %v736_v55  ;;  %vm726_vm15 = vweird.f32 %v1151_v48  ;;  %v806_v53 = vand.u32 2147483648, %v2086_v60 }
  0xeb   :  { %v751_v46 = vmul.f32 %v1153_v57, %v2062_v7  ;;  %v1155_v38 = vpop.eup %1154  ;;  %vm756_vm14 = vweird.f32 %v1153_v57  ;;  %vm727_vm13 = vmor %vm725_vm7, %vm726_vm15  ;;  %vm2479_vm7 = vcmask 256002  }
  0xec   :  { %v722_v19 = vsub.f32 1.0, %v721_v36  ;;  %v1157_v10 = vpop.eup %1156  ;;  %v738_v55 = vmul.f32 %v1149_v15, %v737_v11  ;;  %v766_v39 = vmul.f32 %v1155_v38, %v2065_v50  ;;  %v2143_v11 = vrot.slane %v2053_v14, 5  ;;  %vm757_vm8 = vmor %vm755_vm9, %vm756_vm14 }
  0xed   :  { %v752_v24 = vsub.f32 1.0, %v751_v46  ;;  %v781_v62 = vmul.f32 %v1157_v10, %v2071_v47  ;;  %v1159_v46 = vpop.eup %1158  ;;  %vm771_vm3 = vweird.f32 %v1155_v38  ;;  %vm786_vm10 = vweird.f32 %v1157_v10 }
  0xee   :  { %v723_v27 = vmul.f32 %v1151_v48, %v722_v19  ;;  %v739_v25 = vadd.f32 %v1149_v15, %v738_v55  ;;  %v767_v33 = vsub.f32 1.0, %v766_v39  ;;  %v796_v23 = vmul.f32 %v1159_v46, %v2086_v60 }
  0xef   :  { %v753_v54 = vmul.f32 %v1153_v57, %v752_v24  ;;  %v782_v19 = vsub.f32 1.0, %v781_v62  ;;  %vm801_vm0 = vweird.f32 %v1159_v46  ;;  %vm2478_vm14 = vweird.f32 %v2071_v47 }
  0xf0   :  { %v724_v43 = vadd.f32 %v1151_v48, %v723_v27  ;;  %v743_v58 = vsel %vm742_vm2, %v1149_v15, %v739_v25  ;;  %v768_v28 = vmul.f32 %v1155_v38, %v767_v33  ;;  %v797_v39 = vsub.f32 1.0, %v796_v23  ;;  %vm787_vm2 = vmor %vm2478_vm14, %vm786_vm10 }
  0xf1   :  { %v754_v63 = vadd.f32 %v1153_v57, %v753_v54  ;;  %v748_v27 = vsel %vm2109_vm5, %v747_v37, %v743_v58  ;;  %v783_v62 = vmul.f32 %v1157_v10, %v782_v19  ;;  %1160 = vrcp.f32 %v2143_v11  ;;  %vm2480_vm5 = vmmov %vm2479_vm7 }
  0xf2   :  { %v728_v24 = vsel %vm727_vm13, %v1151_v48, %v724_v43  ;;  %v749_v21 = vmul.f32 %v748_v27, %v2079_v56  ;;  %v769_v25 = vadd.f32 %v1155_v38, %v768_v28  ;;  %vm2477_vm13 = vweird.f32 %v2065_v50  ;;  %vm2481_vm10 = vmmov %vm2480_vm5 }
  0xf3   :  { %v733_v14 = vsel %vm2117_vm1, %v732_v17, %v728_v24  ;;  %v758_v55 = vsel %vm757_vm8, %v1153_v57, %v754_v63  ;;  %vm772_vm15 = vmor %vm2477_vm13, %vm771_vm3  ;;  %v784_v58 = vadd.f32 %v1157_v10, %v783_v62  ;;  %v798_v7 = vmul.f32 %v1159_v46, %v797_v39 }
  0xf4   :  { %v734_v33 = vmul.f32 %v733_v14, %v2076_v6  ;;  %v763_v43 = vsel %vm2123_vm6, %v762_v49, %v758_v55  ;;  %v773_v48 = vsel %vm772_vm15, %v1155_v38, %v769_v25  ;;  %v792_v63 = vor.u32 1.1754944e-38, %v791_v29  ;;  %1000 = vst.msk [vmem:[%s2350_s3 + $0x4] sm:$0x4] %vm2479_vm7, %v749_v21  ;;  %vm2482_vm1 = vmmov %vm2480_vm5 }
  0xf5   :  { %v764_v15 = vmul.f32 %v763_v43, %v2083_v44  ;;  %v778_v28 = vsel %vm2131_vm12, %v777_v5, %v773_v48  ;;  %v788_v50 = vsel %vm787_vm2, %v1157_v10, %v784_v58  ;;  %v799_v6 = vadd.f32 %v1159_v46, %v798_v7 }
  0xf6   :  { %vm800_vm3 = vweird.f32 %v2086_v60  ;;  %999 = vst.msk [vmem:[%s2350_s3] sm:$0x4] %vm2480_vm5, %v734_v33  ;;  %v779_v47 = vmul.f32 %v778_v28, %v2095_v26  ;;  %v793_v56 = vsel %vm2137_vm11, %v792_v63, %v788_v50  ;;  %v807_v44 = vor.u32 1.1754944e-38, %v806_v53  ;;  %vm2483_vm11 = vmmov %vm2482_vm1 }
  0xf7   :  { %vm802_vm9 = vmor %vm800_vm3, %vm801_vm0  ;;  %1001 = vst.msk [vmem:[%s2350_s3 + $0x8] sm:$0x4] %vm2481_vm10, %v764_v15  ;;  %v794_v60 = vmul.f32 %v793_v56, %v2098_v42  ;;  %vm805_vm12 = vcmp.eq.f32.partialorder %v804_v41, 8.507059e+37  ;;  %v1161_v57 = vpop.eup %1160  ;;  %v821_v13 = vand.u32 2147483648, %v2143_v11  ;;  %v685_v49 = vrot.slane %v1772_v30, 7 }
  0xf8   :  { %v803_v17 = vsel %vm802_vm9, %v1159_v46, %v799_v6  ;;  %1002 = vst.msk [vmem:[%s2350_s3 + $0xc] sm:$0x4] %vm2482_vm1, %v779_v47  ;;  %vm2484_vm0 = vmmov %vm2482_vm1  ;;  %v811_v41 = vmul.f32 %v1161_v57, %v2143_v11  ;;  %vm816_vm4 = vweird.f32 %v1161_v57  ;;  %vm815_vm6 = vweird.f32 %v2143_v11  ;;  %v666_v10 = vpop.xlane.xlu1 %665 }
  0xf9   :  { %v808_v20 = vsel %vm805_vm12, %v807_v44, %v803_v17  ;;  %1003 = vst.msk [vmem:[%s2350_s3 + $0x10] sm:$0x4] %vm2483_vm11, %v794_v60  ;;  %vm817_vm8 = vmor %vm815_vm6, %vm816_vm4  ;;  %v822_v29 = vor.u32 1.1754944e-38, %v821_v13  ;;  %v701_v38 = vmul.f32 %v685_v49, %v1772_v30  ;;  %v1218_v46 = vmov 0  }
  0xfa   :  { %v809_v26 = vmul.f32 %v808_v20, %v2103_v16  ;;  %v812_v42 = vsub.f32 1.0, %v811_v41  ;;  %v819_v16 = vand.u32 2147483647, %v2143_v11  ;;  %1066 = vset.pattern.permute.xlu2 %v1218_v46  ;;  %1067 = vset.pattern.permute.xlu0 %v1218_v46  ;;  %vm2485_vm15 = vmmov %vm2484_vm0  ;;  %v453_v54 = vrot.slane %v1259_v0, 5 }
  0xfb   :  { %v454_v19 = vrot.slane %v1264_v1, 5  ;;  %v455_v23 = vrot.slane %v1269_v2, 5  ;;  %v456_v24 = vrot.slane %v1274_v3, 5  ;;  %vm2486_vm14 = vcmask 253952   ;;  %v2487_v3 = vld [vmem:[#allocation8_spill] sm:$0xff] }
  0xfc   :  { %1004 = vst.msk [vmem:[%s2350_s3 + $0x14] sm:$0x4] %vm2484_vm0, %v809_v26  ;;  %v813_v37 = vmul.f32 %v1161_v57, %v812_v42  ;;  %vm820_vm13 = vcmp.eq.f32.partialorder %v819_v16, 8.507059e+37  ;;  %v2222_v27 = vmul.f32 %v1793_v61, %v453_v54  ;;  %vm2488_vm2 = vmmov %vm2486_vm14  ;;  %vm872_vm5 = vcmask 1042432  }
  0xfd   :  { %v2225_v62 = vmul.f32 %v1798_v35, %v454_v19  ;;  %v2228_v1 = vmul.f32 %v1804_v18, %v455_v23  ;;  %v2236_v61 = vmul.f32 %v2487_v3, %v456_v24  ;;  %vm2489_vm7 = vmmov %vm2488_vm2  ;;  %v686_v33 = vrot.slane %v2004_v22, 7  ;;  %v2503_v3 = vld [vmem:[#allocation9_spill] sm:$0xff] }
  0xfe   :  { %v814_v52 = vadd.f32 %v1161_v57, %v813_v37  ;;  %990 = vst.msk [vmem:[%s2350_s3 + $0x1] sm:$0x1] %vm2486_vm14, %v2222_v27  ;;  %vm2490_vm3 = vmmov %vm2488_vm2  ;;  %v457_v37 = vrot.slane %v1279_v4, 5  ;;  %v458_v16 = vrot.slane %v1288_v9, 5  ;;  %v459_v49 = vrot.slane %v1295_v12, 5 }
  0xff   :  { %991 = vst.msk [vmem:[%s2350_s3 + $0x5] sm:$0x1] %vm2488_vm2, %v2225_v62  ;;  %v702_v28 = vmul.f32 %v686_v33, %v2004_v22  ;;  %vm2494_vm14 = vmmov %vm2488_vm2  ;;  %v848_v4 = vrot.slane %v2222_v27, 6  ;;  %v849_v9 = vrot.slane %v2225_v62, 6  ;;  %v850_v12 = vrot.slane %v2228_v1, 6 }
 0x100   :  { %v818_v5 = vsel %vm817_vm8, %v1161_v57, %v814_v52  ;;  %992 = vst.msk [vmem:[%s2350_s3 + $0x9] sm:$0x1] %vm2489_vm7, %v2228_v1  ;;  %v670_v20 = vpop.xlane.xlu1 %669  ;;  %vm2491_vm8 = vmmov %vm2485_vm15  ;;  %v460_v52 = vrot.slane %v1862_v45, 5  ;;  %v2495_v45 = vld [vmem:[#allocation11_spill] sm:$0xff] }
 0x101   :  { %v823_v34 = vsel %vm820_vm13, %v822_v29, %v818_v5  ;;  %993 = vst.msk [vmem:[%s2350_s3 + $0xd] sm:$0x1] %vm2490_vm3, %v2236_v61  ;;  %v473_v29 = vmul.f32 %v1814_v40, %v457_v37  ;;  %v475_v5 = vmul.f32 %v1833_v31, %v459_v49  ;;  %vm2492_vm13 = vmmov %vm2488_vm2  ;;  %v851_v40 = vrot.slane %v2236_v61, 6  ;;  %v2502_v1 = vld [vmem:[#allocation15_spill] sm:$0xff] }
 0x102   :  { %v824_v36 = vmul.f32 %v823_v34, %v701_v38  ;;  %v876_v53 = vmul.f32 %v823_v34, %v666_v10  ;;  %v474_v38 = vmul.f32 %v1819_v32, %v458_v16  ;;  %v476_v10 = vmul.f32 %v2044_v51, %v460_v52  ;;  %v2496_v34 = vld [vmem:[#allocation12_spill] sm:$0xff]  ;;  %vm2497_vm7 = vmmov %vm2491_vm8 }
 0x103   :  { %994 = vst.msk [vmem:[%s2350_s3 + $0x11] sm:$0x1] %vm2492_vm13, %v473_v29  ;;  %v864_v32 = vmul.f32 %v848_v4, %v1535_v8  ;;  %v865_v31 = vmul.f32 %v849_v9, %v1540_v59  ;;  %v866_v51 = vmul.f32 %v850_v12, %v2495_v45  ;;  %vm2498_vm3 = vmmov %vm2497_vm7  ;;  %v2500_v8 = vld [vmem:[#allocation10_spill] sm:$0xff] }
 0x104   :  { %1005 = vst.msk [vmem:[%s2350_s3 + $0x18] sm:$0x4] %vm2485_vm15, %v824_v36  ;;  %894 = vperm.xlu2 %1066, %v876_v53   ;;  %vm2493_vm15 = vmmov %vm2488_vm2  ;;  %v867_v36 = vmul.f32 %v851_v40, %v2496_v34  ;;  %v931_v59 = vrot.slane %v2500_v8, 7 }
 0x105   :  { %995 = vst.msk [vmem:[%s2350_s3 + $0x15] sm:$0x1] %vm2493_vm15, %v474_v38  ;;  %vm2519_vm13 = vmmov %vm2498_vm3 }
 0x106   :  { %996 = vst.msk [vmem:[%s2350_s3 + $0x19] sm:$0x1] %vm2494_vm14, %v475_v5  ;;  %vm2520_vm15 = vmmov %vm2498_vm3 }
 0x107   :  { %997 = vst.msk [vmem:[%s2350_s3 + $0x1d] sm:$0x1] %vm2488_vm2, %v476_v10  ;;  %vm2521_vm14 = vmmov %vm2498_vm3 }
 0x115   :  { %v626_v0 = vpop.xlane.xlu0 %625 }
 0x116   :  { %v628_v2 = vand.u32 2147483647, %v626_v0 }
 0x118   :  { %v630_v35 = vmax.f32 %v628_v2, 1.0  ;;  %v933_v2 = vrot.slane %v2502_v1, 6 }
 0x11a   :  { %v711_v18 = vrot.slane %v630_v35, 6  ;;  %v873_v39 = vrot.slane %v630_v35, 5  ;;  %v2505_v35 = vld [vmem:[#allocation16_spill] sm:$0xff] }
 0x11c   :  { %1162 = vrcp.f32 %v711_v18  ;;  %v874_v14 = vsel %vm872_vm5, %v2143_v11, %v873_v39  ;;  %v836_v7 = vand.u32 2147483648, %v711_v18  ;;  %v834_v48 = vand.u32 2147483647, %v711_v18  ;;  %vm2499_vm5 = vmmov %vm2498_vm3 }
 0x11d   :  { %1164 = vrcp.f32 %v874_v14  ;;  %vm830_vm10 = vweird.f32 %v711_v18  ;;  %v888_v50 = vand.u32 2147483648, %v874_v14  ;;  %v886_v11 = vand.u32 2147483647, %v874_v14 }
 0x11e   :  { %v837_v56 = vor.u32 1.1754944e-38, %v836_v7  ;;  %vm835_vm11 = vcmp.eq.f32.partialorder %v834_v48, 8.507059e+37  ;;  %vm882_vm0 = vweird.f32 %v874_v14  ;;  %v2513_v48 = vld [vmem:[#allocation20_spill] sm:$0xff] }
 0x11f   :  { %v889_v26 = vor.u32 1.1754944e-38, %v888_v50  ;;  %vm887_vm6 = vcmp.eq.f32.partialorder %v886_v11, 8.507059e+37  ;;  %v854_v50 = vrot.slane %v475_v5, 6  ;;  %v855_v11 = vrot.slane %v476_v10, 6 }
 0x122   :  { %v1163_v21 = vpop.eup %1162 }
 0x123   :  { %v826_v55 = vmul.f32 %v1163_v21, %v711_v18  ;;  %v1165_v25 = vpop.eup %1164  ;;  %vm831_vm9 = vweird.f32 %v1163_v21  ;;  %v935_v18 = vrot.slane %v2505_v35, 5 }
 0x124   :  { %v878_v58 = vmul.f32 %v1165_v25, %v874_v14  ;;  %vm883_vm12 = vweird.f32 %v1165_v25  ;;  %vm832_vm1 = vmor %vm830_vm10, %vm831_vm9  ;;  %vm2504_vm10 = vcmask 1042434   ;;  %v2507_v14 = vld [vmem:[#allocation17_spill] sm:$0xff] }
 0x125   :  { %v827_v43 = vsub.f32 1.0, %v826_v55  ;;  %vm884_vm4 = vmor %vm882_vm0, %vm883_vm12  ;;  %v932_v61 = vsel %vm2504_vm10, %v931_v59, %v2503_v3  ;;  %vm2506_vm12 = vcmask 1043459   ;;  %vm2512_vm0 = vcmask 1046534  }
 0x126   :  { %v879_v63 = vsub.f32 1.0, %v878_v58  ;;  %vm2501_vm9 = vmmov %vm2498_vm3  ;;  %v934_v39 = vsel %vm2506_vm12, %v933_v2, %v932_v61  ;;  %v2511_v58 = vld [vmem:[#allocation19_spill] sm:$0xff] }
 0x127   :  { %v828_v15 = vmul.f32 %v1163_v21, %v827_v43  ;;  %v941_v7 = vrot.slane %v2511_v58, 2 }
 0x128   :  { %v880_v47 = vmul.f32 %v1165_v25, %v879_v63  ;;  %v943_v63 = vrot.slane %v2513_v48, 1 }
 0x129   :  { %v829_v6 = vadd.f32 %v1163_v21, %v828_v15 }
 0x12a   :  { %v881_v60 = vadd.f32 %v1165_v25, %v880_v47  ;;  %v853_v47 = vrot.slane %v474_v38, 6 }
 0x12b   :  { %v833_v44 = vsel %vm832_vm1, %v1163_v21, %v829_v6  ;;  %v937_v21 = vrot.slane %v2507_v14, 4  ;;  %vm2508_vm1 = vcmask 1044484   ;;  %v852_v6 = vrot.slane %v473_v29, 6 }
 0x12c   :  { %v838_v17 = vsel %vm835_vm11, %v837_v56, %v833_v44  ;;  %v885_v41 = vsel %vm884_vm4, %v1165_v25, %v881_v60  ;;  %v936_v55 = vsel %vm2508_vm1, %v935_v18, %v934_v39  ;;  %v2509_v25 = vld [vmem:[#allocation18_spill] sm:$0xff]  ;;  %vm2510_vm11 = vcmask 1045509   ;;  %v2517_v44 = vld [vmem:[#allocation13_spill] sm:$0xff] }
 0x12d   :  { %v839_v57 = vmul.f32 %v838_v17, %v702_v28  ;;  %v890_v42 = vsel %vm887_vm6, %v889_v26, %v885_v41  ;;  %v939_v33 = vrot.slane %v2509_v25, 3  ;;  %v938_v43 = vsel %vm2510_vm11, %v937_v21, %v936_v55  ;;  %v2518_v17 = vld [vmem:[#allocation14_spill] sm:$0xff] }
 0x12e   :  { %v891_v13 = vmul.f32 %v890_v42, %v670_v20  ;;  %vm2514_vm4 = vcmask 1047559   ;;  %vm2515_vm6 = vcmask 261121   ;;  %v870_v56 = vmul.f32 %v854_v50, %v1772_v30 }
 0x12f   :  { %1006 = vst.msk [vmem:[%s2350_s3 + $0x1c] sm:$0x4] %vm2491_vm8, %v839_v57  ;;  %v940_v15 = vsel %vm2512_vm0, %v939_v33, %v938_v43  ;;  %vm2516_vm8 = vmmov %vm2488_vm2  ;;  %v868_v60 = vmul.f32 %v852_v6, %v2517_v44  ;;  %v869_v20 = vmul.f32 %v853_v47, %v2518_v17  ;;  %v871_v26 = vmul.f32 %v855_v11, %v2004_v22 }
 0x130   :  { %898 = vperm.xlu2 %1066, %v891_v13   ;;  %v942_v28 = vsel %vm2514_vm4, %v941_v7, %v940_v15  ;;  %947 = vst.msk [vmem:[#allocation2 + $0x7] sm:$0x1] %vm2516_vm8, %v943_v63  ;;  %vm2522_vm2 = vmmov %vm2498_vm3 }
 0x131   :  { %946 = vst.msk [vmem:[#allocation2 - $0x1] sm:$0xfe] %vm2515_vm6, %v942_v28 }
 0x132   :  { %1029 = dma.vmem_to_hbm [thread:$0]  %s1025_s24, 128, %s1027_s27, [#allocation3]  }
 0x15e   :  { %v895_v53 = vpop.permute.xlu2 %894 }
 0x15f   :  { %v900_v46 = vrot.slane %v895_v53, 2  ;;  %v901_v54 = vrot.slane %v895_v53, 3  ;;  %v902_v19 = vrot.slane %v895_v53, 4  ;;  %v903_v23 = vrot.slane %v895_v53, 5 }
 0x161   :  { %v915_v24 = vmul.f32 %v900_v46, %v864_v32  ;;  %v916_v27 = vmul.f32 %v901_v54, %v865_v31  ;;  %v917_v62 = vmul.f32 %v902_v19, %v866_v51  ;;  %v918_v0 = vmul.f32 %v903_v23, %v867_v36 }
 0x163   :  { %1007 = vst.msk [vmem:[%s2350_s3 + $0x1] sm:$0x4] %vm2497_vm7, %v915_v24 }
 0x164   :  { %1008 = vst.msk [vmem:[%s2350_s3 + $0x5] sm:$0x4] %vm2498_vm3, %v916_v27 }
 0x165   :  { %1009 = vst.msk [vmem:[%s2350_s3 + $0x9] sm:$0x4] %vm2499_vm5, %v917_v62 }
 0x166   :  { %1010 = vst.msk [vmem:[%s2350_s3 + $0xd] sm:$0x4] %vm2501_vm9, %v918_v0 }
 0x18a   :  { %v899_v57 = vpop.permute.xlu2 %898 }
 0x18b   :  { %v904_v41 = vrot.slane %v899_v57, 6  ;;  %v905_v42 = vrot.slane %v899_v57, 7  ;;  %v906_v13 = vrot.slane %v899_v57, 1  ;;  %v921_v37 = vmul.f32 %v899_v57, %v870_v56 }
 0x18d   :  { %v919_v16 = vmul.f32 %v904_v41, %v868_v60  ;;  %v920_v49 = vmul.f32 %v905_v42, %v869_v20  ;;  %v922_v52 = vmul.f32 %v906_v13, %v871_v26  ;;  %1013 = vst.msk [vmem:[%s2350_s3 + $0x19] sm:$0x4] %vm2519_vm13, %v921_v37 }
 0x18f   :  { %1011 = vst.msk [vmem:[%s2350_s3 + $0x11] sm:$0x4] %vm2520_vm15, %v919_v16 }
 0x190   :  { %1012 = vst.msk [vmem:[%s2350_s3 + $0x15] sm:$0x4] %vm2521_vm14, %v920_v49 }
 0x191   :  { %1014 = vst.msk [vmem:[%s2350_s3 + $0x1d] sm:$0x4] %vm2522_vm2, %v922_v52 }
 0x192   :  { %1214 = dma.done.wait [#allocation3], 128  }
 0x193   :  { %1215 = vsyncadd [#allocation3], 4294967168 }
 0x194   :  { %1216 = dma.done.wait [#allocation5], 128  }
 0x195   :  { %1217 = vsyncadd [#allocation5], 4294967168 }
 0x196   :  { %1053 = vsyncpa [#allocation3], 1 }
 0x197   :  { %1054 = vsyncpa [#allocation5], 1 }

// kernel: mlstm_cell.5
= control target key start
LH: loop header
LB: loop body
LE: loop exit
PB: predicated region body
PF: predicated region fallthrough
CT: control target
= control target key end

     0   :  { %vm136_vm0 = vcmask 261120   ;;  %s1044_s19 = smov 127   ;;  %vm553_vm1 = vcmask 7168   ;;  %s2181_s1 = inlined_call_operand.vmem [shape: f32[8,2,32], index: 1, kind: input, shape index: {}]   ;;  %s2182_s2 = inlined_call_operand.vmem [shape: f32[8,32,32], index: 2, kind: input, shape index: {}, may-alias: {2,4}]   ;;  %s2183_s0 = inlined_call_operand.vmem [shape: f32[8,32,4], index: 0, kind: input, shape index: {}]   ;;  %s2184_s3 = inlined_call_operand.vmem [shape: f32[8,32,1], index: 3, kind: output, shape index: {0}]   ;;  %s2185_s4 = inlined_call_operand.vmem [shape: f32[8,32,32], index: 4, kind: output, shape index: {1}, may-alias: {2,4}]  }
   0x1   :  { %v68_v0 = vld [vmem:[%s2182_s2 + $0x20] sm:$0xff]  ;;  %v66_v2 = vld [vmem:[%s2182_s2 + $0x10] sm:$0xff]  ;;  %v69_v8 = vld [vmem:[%s2182_s2 + $0x28] sm:$0xff] }
   0x2   :  { %v996_v1 = vld [vmem:[%s2181_s1 + $0x3] ss:$0 sm:$0xff]  ;;  %v997_v3 = vld [vmem:[%s2181_s1 + $0x1] ss:$0 sm:$0xff]  ;;  %v67_v10 = vld [vmem:[%s2182_s2 + $0x18] sm:$0xff] }
   0x3   :  { %v108_v4 = vmul.f32 %v996_v1, %v68_v0  ;;  %v64_v5 = vld [vmem:[%s2182_s2] sm:$0xff]  ;;  %v106_v6 = vmul.f32 %v997_v3, %v66_v2  ;;  %v65_v11 = vld [vmem:[%s2182_s2 + $0x8] sm:$0xff]  ;;  %v109_v14 = vmul.f32 %v996_v1, %v69_v8  ;;  %v107_v15 = vmul.f32 %v997_v3, %v67_v10  ;;  %v71_v20 = vld [vmem:[%s2182_s2 + $0x38] sm:$0xff] }
   0x4   :  { %v104_v7 = vmul.f32 %v997_v3, %v64_v5  ;;  %v105_v16 = vmul.f32 %v997_v3, %v65_v11  ;;  %v72_v17 = vld [vmem:[%s2182_s2 + $0x40] sm:$0xff]  ;;  %v70_v23 = vld [vmem:[%s2182_s2 + $0x30] sm:$0xff]  ;;  %v111_v25 = vmul.f32 %v996_v1, %v71_v20  ;;  %v75_v30 = vld [vmem:[%s2182_s2 + $0x58] sm:$0xff] }
   0x5   :  { %v149_v9 = vsel %vm136_vm0, %v108_v4, 0.0  ;;  %v143_v12 = vsel %vm136_vm0, %v106_v6, 0.0  ;;  %v152_v18 = vsel %vm136_vm0, %v109_v14, 0.0  ;;  %v998_v19 = vld [vmem:[%s2181_s1 + $0x5] ss:$0 sm:$0xff]  ;;  %v146_v21 = vsel %vm136_vm0, %v107_v15, 0.0 }
   0x6   :  { %150 = vadd.xlane.f32.xlu2 %v149_v9  ;;  %v137_v13 = vsel %vm136_vm0, %v104_v7, 0.0  ;;  %144 = vadd.xlane.f32.xlu1 %v143_v12  ;;  %v140_v22 = vsel %vm136_vm0, %v105_v16, 0.0  ;;  %v112_v24 = vmul.f32 %v998_v19, %v72_v17  ;;  %v110_v26 = vmul.f32 %v996_v1, %v70_v23  ;;  %v74_v31 = vld [vmem:[%s2182_s2 + $0x50] sm:$0xff]  ;;  %v73_v32 = vld [vmem:[%s2182_s2 + $0x48] sm:$0xff]  ;;  %v999_v37 = vld [vmem:[%s2181_s1 + $0x7] ss:$0 sm:$0xff] }
   0x7   :  { %138 = vadd.xlane.f32.xlu0 %v137_v13  ;;  %v158_v28 = vsel %vm136_vm0, %v111_v25, 0.0  ;;  %v115_v33 = vmul.f32 %v998_v19, %v75_v30  ;;  %v114_v34 = vmul.f32 %v998_v19, %v74_v31  ;;  %v113_v35 = vmul.f32 %v998_v19, %v73_v32  ;;  %v78_v40 = vld [vmem:[%s2182_s2 + $0x70] sm:$0xff]  ;;  %v77_v41 = vld [vmem:[%s2182_s2 + $0x68] sm:$0xff]  ;;  %v76_v42 = vld [vmem:[%s2182_s2 + $0x60] sm:$0xff] }
   0x8   :  { %v161_v27 = vsel %vm136_vm0, %v112_v24, 0.0  ;;  %v155_v29 = vsel %vm136_vm0, %v110_v26, 0.0  ;;  %v118_v43 = vmul.f32 %v999_v37, %v78_v40  ;;  %v117_v44 = vmul.f32 %v999_v37, %v77_v41  ;;  %v1000_v47 = vld [vmem:[%s2181_s1 + $0x9] ss:$0 sm:$0xff]  ;;  %v80_v51 = vld [vmem:[%s2182_s2 + $0x80] sm:$0xff]  ;;  %v79_v52 = vld [vmem:[%s2182_s2 + $0x78] sm:$0xff] }
   0x9   :  { %v170_v36 = vsel %vm136_vm0, %v115_v33, 0.0  ;;  %v167_v38 = vsel %vm136_vm0, %v114_v34, 0.0  ;;  %v164_v39 = vsel %vm136_vm0, %v113_v35, 0.0  ;;  %v116_v45 = vmul.f32 %v999_v37, %v76_v42  ;;  %v81_v50 = vld [vmem:[%s2182_s2 + $0x88] sm:$0xff]  ;;  %v84_v60 = vld [vmem:[%s2182_s2 + $0xa0] sm:$0xff]  ;;  %v83_v61 = vld [vmem:[%s2182_s2 + $0x98] sm:$0xff] }
   0xa   :  { %v179_v46 = vsel %vm136_vm0, %v118_v43, 0.0  ;;  %v176_v48 = vsel %vm136_vm0, %v117_v44, 0.0  ;;  %v121_v53 = vmul.f32 %v1000_v47, %v81_v50  ;;  %v120_v54 = vmul.f32 %v1000_v47, %v80_v51  ;;  %v1001_v57 = vld [vmem:[%s2181_s1 + $0xb] ss:$0 sm:$0xff]  ;;  %v82_v62 = vld [vmem:[%s2182_s2 + $0x90] sm:$0xff]  ;;  %v87_v5 = vld [vmem:[%s2182_s2 + $0xb8] sm:$0xff] }
   0xb   :  { %v173_v49 = vsel %vm136_vm0, %v116_v45, 0.0  ;;  %v119_v55 = vmul.f32 %v999_v37, %v79_v52  ;;  %v124_v63 = vmul.f32 %v1001_v57, %v84_v60  ;;  %v123_v0 = vmul.f32 %v1000_v47, %v83_v61  ;;  %v86_v6 = vld [vmem:[%s2182_s2 + $0xb0] sm:$0xff]  ;;  %v85_v7 = vld [vmem:[%s2182_s2 + $0xa8] sm:$0xff]  ;;  %v88_v17 = vld [vmem:[%s2182_s2 + $0xc0] sm:$0xff] }
   0xc   :  { %v188_v56 = vsel %vm136_vm0, %v121_v53, 0.0  ;;  %v185_v58 = vsel %vm136_vm0, %v120_v54, 0.0  ;;  %v122_v1 = vmul.f32 %v1000_v47, %v82_v62  ;;  %v127_v8 = vmul.f32 %v1001_v57, %v87_v5  ;;  %v1002_v12 = vld [vmem:[%s2181_s1 + $0xd] ss:$0 sm:$0xff]  ;;  %v90_v15 = vld [vmem:[%s2182_s2 + $0xd0] sm:$0xff]  ;;  %v92_v26 = vld [vmem:[%s2182_s2 + $0xe0] sm:$0xff] }
   0xd   :  { %v182_v59 = vsel %vm136_vm0, %v119_v55, 0.0  ;;  %v197_v2 = vsel %vm136_vm0, %v124_v63, 0.0  ;;  %v194_v3 = vsel %vm136_vm0, %v123_v0, 0.0  ;;  %v126_v9 = vmul.f32 %v1001_v57, %v86_v6  ;;  %v89_v16 = vld [vmem:[%s2182_s2 + $0xc8] sm:$0xff]  ;;  %v95_v34 = vld [vmem:[%s2182_s2 + $0xf8] sm:$0xff]  ;;  %v94_v35 = vld [vmem:[%s2182_s2 + $0xf0] sm:$0xff] }
   0xe   :  { %153 = vadd.xlane.f32.xlu2 %v152_v18  ;;  %147 = vadd.xlane.f32.xlu1 %v146_v21  ;;  %v191_v4 = vsel %vm136_vm0, %v122_v1, 0.0  ;;  %v125_v10 = vmul.f32 %v1001_v57, %v85_v7  ;;  %v206_v11 = vsel %vm136_vm0, %v127_v8, 0.0  ;;  %v130_v18 = vmul.f32 %v1002_v12, %v90_v15  ;;  %v93_v25 = vld [vmem:[%s2182_s2 + $0xe8] sm:$0xff]  ;;  %v1228_v40 = vld [vmem:[%s2183_s0] sm:$0xff]  ;;  %v1242_v42 = vld [vmem:[%s2183_s0 + $0x18] sm:$0xff] }
   0xf   :  { %141 = vadd.xlane.f32.xlu0 %v140_v22  ;;  %v203_v13 = vsel %vm136_vm0, %v126_v9, 0.0  ;;  %v129_v19 = vmul.f32 %v1002_v12, %v89_v16  ;;  %v128_v20 = vmul.f32 %v1002_v12, %v88_v17  ;;  %v1003_v22 = vld [vmem:[%s2181_s1 + $0xf] ss:$0 sm:$0xff]  ;;  %2202 = vst [vmem:[#allocation2_spill] sm:$0xff] %v1228_v40  ;;  %v1247_v43 = vld [vmem:[%s2183_s0 + $0x10] sm:$0xff]  ;;  %v1256_v44 = vld [vmem:[%s2183_s0 + $0x20] sm:$0xff] }
  0x10   :  { %v200_v14 = vsel %vm136_vm0, %v125_v10, 0.0  ;;  %v215_v21 = vsel %vm136_vm0, %v130_v18, 0.0  ;;  %v134_v37 = vmul.f32 %v1003_v22, %v94_v35  ;;  %v1235_v41 = vld [vmem:[%s2183_s0 + $0x8] sm:$0xff]  ;;  %2203 = vst [vmem:[#allocation3_spill] sm:$0xff] %v1242_v42  ;;  %v1277_v47 = vld [vmem:[%s2183_s0 + $0x38] sm:$0xff]  ;;  %v1290_v51 = vld [vmem:[%s2183_s0 + $0x40] sm:$0xff] }
  0x11   :  { %v212_v23 = vsel %vm136_vm0, %v129_v19, 0.0  ;;  %v209_v24 = vsel %vm136_vm0, %v128_v20, 0.0  ;;  %2204 = vst [vmem:[#allocation4_spill] sm:$0xff] %v1247_v43  ;;  %v1263_v45 = vld [vmem:[%s2183_s0 + $0x28] sm:$0xff]  ;;  %v1304_v53 = vld [vmem:[%s2183_s0 + $0x50] sm:$0xff]  ;;  %v1317_v57 = vld [vmem:[%s2183_s0 + $0x58] sm:$0xff] }
  0x12   :  { %v1295_v52 = vld [vmem:[%s2183_s0 + $0x48] sm:$0xff]  ;;  %v1344_v63 = vld [vmem:[%s2183_s0 + $0x70] sm:$0xff]  ;;  %v1349_v0 = vld [vmem:[%s2183_s0 + $0x78] sm:$0xff] }
  0x13   :  { %v1358_v1 = vld [vmem:[%s2183_s0 + $0x80] sm:$0xff]  ;;  %v1371_v5 = vld [vmem:[%s2183_s0 + $0x88] sm:$0xff]  ;;  %v1376_v6 = vld [vmem:[%s2183_s0 + $0x90] sm:$0xff] }
  0x14   :  { %v1385_v7 = vld [vmem:[%s2183_s0 + $0x98] sm:$0xff]  ;;  %v1396_v10 = vld [vmem:[%s2183_s0 + $0xa0] sm:$0xff]  ;;  %v1439_v19 = vld [vmem:[%s2183_s0 + $0xc8] sm:$0xff] }
  0x15   :  { %v1423_v16 = vld [vmem:[%s2183_s0 + $0xb8] sm:$0xff]  ;;  %v1428_v17 = vld [vmem:[%s2183_s0 + $0xc0] sm:$0xff] }
  0x16   :  { %162 = vadd.xlane.f32.xlu2 %v161_v27  ;;  %159 = vadd.xlane.f32.xlu1 %v158_v28  ;;  %v91_v27 = vld [vmem:[%s2182_s2 + $0xd8] sm:$0xff]  ;;  %v133_v28 = vmul.f32 %v1003_v22, %v93_v25 }
  0x17   :  { %156 = vadd.xlane.f32.xlu0 %v155_v29  ;;  %v132_v29 = vmul.f32 %v1003_v22, %v92_v26  ;;  %v131_v30 = vmul.f32 %v1002_v12, %v91_v27  ;;  %v1403_v12 = vld [vmem:[%s2183_s0 + $0xa8] sm:$0xff] }
  0x18   :  { %v224_v31 = vsel %vm136_vm0, %v133_v28, 0.0  ;;  %v1475_v27 = vld [vmem:[%s2183_s0 + $0xe8] sm:$0xff]  ;;  %v1480_v28 = vld [vmem:[%s2183_s0 + $0xf0] sm:$0xff] }
  0x19   :  { %v221_v32 = vsel %vm136_vm0, %v132_v29, 0.0  ;;  %v218_v33 = vsel %vm136_vm0, %v131_v30, 0.0  ;;  %2207 = vst [vmem:[#allocation7_spill] sm:$0xff] %v1475_v27  ;;  %v1491_v30 = vld [vmem:[%s2183_s0 + $0xf8] sm:$0xff] }
  0x1a   :  { %2208 = vst [vmem:[#allocation8_spill] sm:$0xff] %v1480_v28 }
  0x1b   :  { %2209 = vst [vmem:[#allocation9_spill] sm:$0xff] %v1491_v30 }
  0x1e   :  { %171 = vadd.xlane.f32.xlu2 %v170_v36  ;;  %168 = vadd.xlane.f32.xlu1 %v167_v38  ;;  %v135_v36 = vmul.f32 %v1003_v22, %v95_v34 }
  0x1f   :  { %165 = vadd.xlane.f32.xlu0 %v164_v39  ;;  %v227_v39 = vsel %vm136_vm0, %v134_v37, 0.0 }
  0x20   :  { %v230_v38 = vsel %vm136_vm0, %v135_v36, 0.0 }
  0x26   :  { %180 = vadd.xlane.f32.xlu2 %v179_v46  ;;  %177 = vadd.xlane.f32.xlu1 %v176_v48  ;;  %v1268_v46 = vld [vmem:[%s2183_s0 + $0x30] sm:$0xff] }
  0x27   :  { %174 = vadd.xlane.f32.xlu0 %v173_v49 }
  0x2e   :  { %189 = vadd.xlane.f32.xlu2 %v188_v56  ;;  %186 = vadd.xlane.f32.xlu1 %v185_v58  ;;  %v1322_v58 = vld [vmem:[%s2183_s0 + $0x60] sm:$0xff] }
  0x2f   :  { %183 = vadd.xlane.f32.xlu0 %v182_v59  ;;  %v1331_v59 = vld [vmem:[%s2183_s0 + $0x68] sm:$0xff] }
  0x36   :  { %198 = vadd.xlane.f32.xlu2 %v197_v2  ;;  %195 = vadd.xlane.f32.xlu1 %v194_v3 }
  0x37   :  { %192 = vadd.xlane.f32.xlu0 %v191_v4 }
  0x3e   :  { %207 = vadd.xlane.f32.xlu2 %v206_v11  ;;  %204 = vadd.xlane.f32.xlu1 %v203_v13  ;;  %v1412_v13 = vld [vmem:[%s2183_s0 + $0xb0] sm:$0xff] }
  0x3f   :  { %201 = vadd.xlane.f32.xlu0 %v200_v14 }
  0x46   :  { %216 = vadd.xlane.f32.xlu2 %v215_v21  ;;  %213 = vadd.xlane.f32.xlu1 %v212_v23  ;;  %v1448_v21 = vld [vmem:[%s2183_s0 + $0xd0] sm:$0xff]  ;;  %v1455_v23 = vld [vmem:[%s2183_s0 + $0xd8] sm:$0xff] }
  0x47   :  { %210 = vadd.xlane.f32.xlu0 %v209_v24  ;;  %2205 = vst [vmem:[#allocation5_spill] sm:$0xff] %v1455_v23  ;;  %v1464_v24 = vld [vmem:[%s2183_s0 + $0xe0] sm:$0xff]  ;;  %s1045_s0 = smov 126  }
  0x48   :  { %2206 = vst [vmem:[#allocation6_spill] sm:$0xff] %v1464_v24 }
  0x4e   :  { %225 = vadd.xlane.f32.xlu2 %v224_v31  ;;  %222 = vadd.xlane.f32.xlu1 %v221_v32 }
  0x4f   :  { %219 = vadd.xlane.f32.xlu0 %v218_v33 }
  0x56   :  { %231 = vadd.xlane.f32.xlu1 %v230_v38 }
  0x57   :  { %228 = vadd.xlane.f32.xlu0 %v227_v39 }
  0x66   :  { %297 = vrot.lane.b32.xlu2 %v1228_v40, %s1044_s19 }
  0x6b   :  { %299 = vrot.lane.b32.xlu0 %v1235_v41, %s1044_s19 }
  0x6e   :  { %303 = vrot.lane.b32.xlu2 %v1242_v42, %s1044_s19 }
  0x6f   :  { %301 = vrot.lane.b32.xlu1 %v1247_v43, %s1044_s19 }
  0x73   :  { %305 = vrot.lane.b32.xlu0 %v1256_v44, %s1044_s19 }
  0x76   :  { %307 = vrot.lane.b32.xlu2 %v1263_v45, %s1044_s19 }
  0x77   :  { %309 = vrot.lane.b32.xlu1 %v1268_v46, %s1044_s19 }
  0x79   :  { %v1279_v48 = vpop.xlane.xlu2 %150  ;;  %v1283_v50 = vpop.xlane.xlu1 %144 }
  0x7a   :  { %v1281_v49 = vpop.xlane.xlu0 %138 }
  0x7b   :  { %311 = vrot.lane.b32.xlu0 %v1277_v47, %s1044_s19  ;;  %v233_v36 = vmul.f32 %v1281_v49, %v1228_v40 }
  0x7e   :  { %313 = vrot.lane.b32.xlu2 %v1290_v51, %s1044_s19 }
  0x7f   :  { %315 = vrot.lane.b32.xlu1 %v1295_v52, %s1044_s19 }
  0x81   :  { %v1306_v54 = vpop.xlane.xlu2 %153  ;;  %v1310_v56 = vpop.xlane.xlu1 %147 }
  0x82   :  { %v1308_v55 = vpop.xlane.xlu0 %141 }
  0x83   :  { %317 = vrot.lane.b32.xlu0 %v1304_v53, %s1044_s19 }
  0x86   :  { %319 = vrot.lane.b32.xlu2 %v1317_v57, %s1044_s19 }
  0x87   :  { %321 = vrot.lane.b32.xlu1 %v1322_v58, %s1044_s19 }
  0x89   :  { %v1333_v60 = vpop.xlane.xlu2 %162  ;;  %v1337_v62 = vpop.xlane.xlu1 %159 }
  0x8a   :  { %v1335_v61 = vpop.xlane.xlu0 %156 }
  0x8b   :  { %323 = vrot.lane.b32.xlu0 %v1331_v59, %s1044_s19 }
  0x8e   :  { %325 = vrot.lane.b32.xlu2 %v1344_v63, %s1044_s19 }
  0x8f   :  { %327 = vrot.lane.b32.xlu1 %v1349_v0, %s1044_s19 }
  0x91   :  { %v1360_v2 = vpop.xlane.xlu2 %171  ;;  %v1364_v4 = vpop.xlane.xlu1 %168 }
  0x92   :  { %v1362_v3 = vpop.xlane.xlu0 %165 }
  0x93   :  { %329 = vrot.lane.b32.xlu0 %v1358_v1, %s1044_s19 }
  0x96   :  { %331 = vrot.lane.b32.xlu2 %v1371_v5, %s1044_s19 }
  0x97   :  { %333 = vrot.lane.b32.xlu1 %v1376_v6, %s1044_s19 }
  0x99   :  { %v1387_v8 = vpop.xlane.xlu2 %180  ;;  %v1398_v11 = vpop.xlane.xlu1 %177 }
  0x9a   :  { %v1389_v9 = vpop.xlane.xlu0 %174 }
  0x9b   :  { %335 = vrot.lane.b32.xlu0 %v1385_v7, %s1044_s19 }
  0x9e   :  { %337 = vrot.lane.b32.xlu2 %v1396_v10, %s1044_s19 }
  0x9f   :  { %339 = vrot.lane.b32.xlu1 %v1403_v12, %s1044_s19 }
  0xa1   :  { %v1414_v14 = vpop.xlane.xlu2 %189  ;;  %v1432_v18 = vpop.xlane.xlu1 %186 }
  0xa2   :  { %v1416_v15 = vpop.xlane.xlu0 %183 }
  0xa3   :  { %341 = vrot.lane.b32.xlu0 %v1412_v13, %s1044_s19 }
  0xa6   :  { %343 = vrot.lane.b32.xlu2 %v1423_v16, %s1044_s19 }
  0xa7   :  { %345 = vrot.lane.b32.xlu1 %v1428_v17, %s1044_s19 }
  0xa9   :  { %v1441_v20 = vpop.xlane.xlu2 %198  ;;  %v1466_v25 = vpop.xlane.xlu1 %195 }
  0xaa   :  { %v1450_v22 = vpop.xlane.xlu0 %192 }
  0xab   :  { %347 = vrot.lane.b32.xlu0 %v1439_v19, %s1044_s19 }
  0xae   :  { %349 = vrot.lane.b32.xlu2 %v1448_v21, %s1044_s19 }
  0xaf   :  { %351 = vrot.lane.b32.xlu1 %v1455_v23, %s1044_s19 }
  0xb1   :  { %v1468_v26 = vpop.xlane.xlu2 %207  ;;  %v1495_v32 = vpop.xlane.xlu1 %204 }
  0xb2   :  { %v1484_v29 = vpop.xlane.xlu0 %201 }
  0xb3   :  { %353 = vrot.lane.b32.xlu0 %v1464_v24, %s1044_s19 }
  0xb6   :  { %355 = vrot.lane.b32.xlu2 %v1475_v27, %s1044_s19 }
  0xb7   :  { %357 = vrot.lane.b32.xlu1 %v1480_v28, %s1044_s19 }
  0xb9   :  { %v1493_v31 = vpop.xlane.xlu2 %216  ;;  %v1503_v35 = vpop.xlane.xlu1 %213 }
  0xba   :  { %v1499_v33 = vpop.xlane.xlu0 %210 }
  0xbb   :  { %359 = vrot.lane.b32.xlu0 %v1491_v30, %s1044_s19  ;;  %v236_v30 = vmul.f32 %v1310_v56, %v1242_v42 }
  0xc1   :  { %v1501_v34 = vpop.xlane.xlu2 %225  ;;  %v1510_v28 = vpop.xlane.xlu1 %222 }
  0xc2   :  { %2210 = vst [vmem:[#allocation10_spill] sm:$0xff] %v1501_v34  ;;  %v1507_v39 = vpop.xlane.xlu0 %219 }
  0xc9   :  { %v298_v37 = vpop.permute.xlu2 %297  ;;  %v1517_v23 = vpop.xlane.xlu1 %231 }
  0xca   :  { %v393_v38 = vadd.f32 %v298_v37, %v233_v36  ;;  %v1515_v34 = vpop.xlane.xlu0 %228  ;;  %2211 = vst [vmem:[#allocation11_spill] sm:$0xff] %v1517_v23  ;;  %v234_v36 = vmul.f32 %v1308_v55, %v1235_v41  ;;  %v238_v55 = vmul.f32 %v1306_v54, %v1263_v45  ;;  %v241_v54 = vmul.f32 %v1333_v60, %v1290_v51 }
  0xcb   :  { %v244_v60 = vmul.f32 %v1360_v2, %v1317_v57  ;;  %v247_v2 = vmul.f32 %v1387_v8, %v1344_v63  ;;  %v250_v8 = vmul.f32 %v1414_v14, %v1371_v5  ;;  %v253_v14 = vmul.f32 %v1441_v20, %v1396_v10 }
  0xcc   :  { %457 = vrot.lane.b32.xlu2 %v393_v38, %s1045_s0  ;;  %v235_v38 = vmul.f32 %v1283_v50, %v1247_v43 }
  0xd1   :  { %v304_v27 = vpop.permute.xlu2 %303 }
  0xd2   :  { %v396_v24 = vadd.f32 %v304_v27, %v236_v30 }
  0xd4   :  { %463 = vrot.lane.b32.xlu2 %v396_v24, %s1045_s0  ;;  %v237_v24 = vmul.f32 %v1279_v48, %v1256_v44 }
  0xd9   :  { %v308_v49 = vpop.permute.xlu2 %307 }
  0xdd   :  { %v300_v37 = vpop.permute.xlu0 %299 }
  0xde   :  { %v394_v40 = vadd.f32 %v300_v37, %v234_v36  ;;  %v398_v37 = vadd.f32 %v308_v49, %v238_v55 }
  0xe0   :  { %459 = vrot.lane.b32.xlu1 %v394_v40, %s1045_s0  ;;  %v239_v40 = vmul.f32 %v1335_v61, %v1268_v46  ;;  %v242_v61 = vmul.f32 %v1362_v3, %v1295_v52  ;;  %v245_v3 = vmul.f32 %v1389_v9, %v1322_v58  ;;  %v248_v9 = vmul.f32 %v1416_v15, %v1349_v0 }
  0xe1   :  { %v314_v56 = vpop.permute.xlu2 %313  ;;  %v302_v42 = vpop.permute.xlu1 %301  ;;  %v251_v15 = vmul.f32 %v1450_v22, %v1376_v6  ;;  %v254_v22 = vmul.f32 %v1484_v29, %v1403_v12  ;;  %v256_v29 = vmul.f32 %v1468_v26, %v1423_v16  ;;  %v259_v26 = vmul.f32 %v1493_v31, %v1448_v21  ;;  %v2214_v31 = vld [vmem:[#allocation7_spill] sm:$0xff] }
  0xe2   :  { %v395_v27 = vadd.f32 %v302_v42, %v235_v38  ;;  %v240_v42 = vmul.f32 %v1337_v62, %v1277_v47  ;;  %v243_v62 = vmul.f32 %v1364_v4, %v1304_v53  ;;  %v246_v4 = vmul.f32 %v1398_v11, %v1331_v59 }
  0xe3   :  { %v249_v11 = vmul.f32 %v1432_v18, %v1358_v1  ;;  %v252_v18 = vmul.f32 %v1466_v25, %v1385_v7 }
  0xe4   :  { %461 = vrot.lane.b32.xlu0 %v395_v27, %s1045_s0  ;;  %v401_v27 = vadd.f32 %v314_v56, %v241_v54 }
  0xe5   :  { %v306_v30 = vpop.permute.xlu0 %305 }
  0xe6   :  { %v397_v23 = vadd.f32 %v306_v30, %v237_v24 }
  0xe8   :  { %465 = vrot.lane.b32.xlu1 %v397_v23, %s1045_s0 }
  0xe9   :  { %v320_v36 = vpop.permute.xlu2 %319  ;;  %v310_v50 = vpop.permute.xlu1 %309 }
  0xea   :  { %v399_v43 = vadd.f32 %v310_v50, %v239_v40  ;;  %v404_v40 = vadd.f32 %v320_v36, %v244_v60  ;;  %v1046_v60 = vmov 0  }
  0xeb   :  { %991 = vset.pattern.permute.xlu2 %v1046_v60  ;;  %990 = vset.pattern.permute.xlu0 %v1046_v60 }
  0xec   :  { %467 = vrot.lane.b32.xlu0 %v398_v37, %s1045_s0  ;;  %469 = vrot.lane.b32.xlu2 %v399_v43, %s1045_s0 }
  0xed   :  { %v312_v48 = vpop.permute.xlu0 %311  ;;  %992 = vset.pattern.permute.xlu1 %v1046_v60 }
  0xee   :  { %v400_v38 = vadd.f32 %v312_v48, %v240_v42 }
  0xf0   :  { %471 = vrot.lane.b32.xlu1 %v400_v38, %s1045_s0 }
  0xf1   :  { %v326_v23 = vpop.permute.xlu2 %325  ;;  %v316_v49 = vpop.permute.xlu1 %315 }
  0xf2   :  { %v402_v24 = vadd.f32 %v316_v49, %v242_v61  ;;  %v407_v38 = vadd.f32 %v326_v23, %v247_v2 }
  0xf4   :  { %473 = vrot.lane.b32.xlu0 %v401_v27, %s1045_s0  ;;  %475 = vrot.lane.b32.xlu2 %v402_v24, %s1045_s0 }
  0xf5   :  { %v318_v30 = vpop.permute.xlu0 %317 }
  0xf6   :  { %v403_v43 = vadd.f32 %v318_v30, %v243_v62 }
  0xf8   :  { %477 = vrot.lane.b32.xlu1 %v403_v43, %s1045_s0 }
  0xf9   :  { %v332_v55 = vpop.permute.xlu2 %331  ;;  %v322_v56 = vpop.permute.xlu1 %321 }
  0xfa   :  { %v405_v50 = vadd.f32 %v322_v56, %v245_v3  ;;  %v410_v24 = vadd.f32 %v332_v55, %v250_v8  ;;  %v255_v56 = vmul.f32 %v1495_v32, %v1412_v13  ;;  %v258_v32 = vmul.f32 %v1503_v35, %v1439_v19 }
  0xfc   :  { %479 = vrot.lane.b32.xlu0 %v404_v40, %s1045_s0  ;;  %481 = vrot.lane.b32.xlu2 %v405_v50, %s1045_s0 }
  0xfd   :  { %v324_v37 = vpop.permute.xlu0 %323 }
  0xfe   :  { %v406_v42 = vadd.f32 %v324_v37, %v246_v4  ;;  %v257_v4 = vmul.f32 %v1499_v33, %v1428_v17 }
 0x100   :  { %483 = vrot.lane.b32.xlu1 %v406_v42, %s1045_s0 }
 0x101   :  { %v338_v48 = vpop.permute.xlu2 %337  ;;  %v328_v36 = vpop.permute.xlu1 %327 }
 0x102   :  { %v408_v54 = vadd.f32 %v328_v36, %v248_v9  ;;  %v413_v25 = vadd.f32 %v338_v48, %v253_v14  ;;  %v2218_v14 = vld [vmem:[#allocation11_spill] sm:$0xff] }
 0x104   :  { %485 = vrot.lane.b32.xlu0 %v407_v38, %s1045_s0  ;;  %487 = vrot.lane.b32.xlu2 %v408_v54, %s1045_s0  ;;  %v2212_v38 = vld [vmem:[#allocation5_spill] sm:$0xff] }
 0x105   :  { %v330_v61 = vpop.permute.xlu0 %329  ;;  %v260_v33 = vmul.f32 %v1507_v39, %v2212_v38  ;;  %v2215_v39 = vld [vmem:[#allocation10_spill] sm:$0xff] }
 0x106   :  { %v409_v49 = vadd.f32 %v330_v61, %v249_v11 }
 0x108   :  { %489 = vrot.lane.b32.xlu1 %v409_v49, %s1045_s0  ;;  %v2213_v49 = vld [vmem:[#allocation6_spill] sm:$0xff] }
 0x109   :  { %v334_v27 = vpop.permute.xlu1 %333  ;;  %v344_v23 = vpop.permute.xlu2 %343  ;;  %v261_v35 = vmul.f32 %v1510_v28, %v2213_v49 }
 0x10a   :  { %v411_v62 = vadd.f32 %v334_v27, %v251_v15  ;;  %v416_v42 = vadd.f32 %v344_v23, %v256_v29  ;;  %v262_v23 = vmul.f32 %v2215_v39, %v2214_v31  ;;  %v1047_v39 = vmov 1  }
 0x10c   :  { %491 = vrot.lane.b32.xlu0 %v410_v24, %s1045_s0  ;;  %493 = vrot.lane.b32.xlu2 %v411_v62, %s1045_s0  ;;  %v2216_v24 = vld [vmem:[#allocation8_spill] sm:$0xff] }
 0x10d   :  { %v336_v30 = vpop.permute.xlu0 %335  ;;  %v263_v28 = vmul.f32 %v1515_v34, %v2216_v24  ;;  %v2219_v34 = vld [vmem:[#allocation2_spill] sm:$0xff] }
 0x10e   :  { %v412_v43 = vadd.f32 %v336_v30, %v252_v18 }
 0x110   :  { %495 = vrot.lane.b32.xlu1 %v412_v43, %s1045_s0  ;;  %v2217_v43 = vld [vmem:[#allocation9_spill] sm:$0xff] }
 0x111   :  { %v340_v3 = vpop.permute.xlu1 %339  ;;  %v350_v40 = vpop.permute.xlu2 %349 }
 0x112   :  { %v414_v55 = vadd.f32 %v340_v3, %v254_v22  ;;  %v419_v11 = vadd.f32 %v350_v40, %v259_v26  ;;  %v264_v22 = vmul.f32 %v2218_v14, %v2217_v43 }
 0x114   :  { %497 = vrot.lane.b32.xlu0 %v413_v25, %s1045_s0  ;;  %499 = vrot.lane.b32.xlu2 %v414_v55, %s1045_s0  ;;  %v2220_v55 = vld [vmem:[#allocation4_spill] sm:$0xff] }
 0x115   :  { %v342_v50 = vpop.permute.xlu0 %341 }
 0x116   :  { %v415_v20 = vadd.f32 %v342_v50, %v255_v56  ;;  %v2221_v56 = vld [vmem:[#allocation3_spill] sm:$0xff] }
 0x118   :  { %501 = vrot.lane.b32.xlu1 %v415_v20, %s1045_s0 }
 0x119   :  { %v346_v37 = vpop.permute.xlu1 %345  ;;  %v356_v48 = vpop.permute.xlu2 %355 }
 0x11a   :  { %v417_v2 = vadd.f32 %v346_v37, %v257_v4  ;;  %v422_v18 = vadd.f32 %v356_v48, %v262_v23 }
 0x11c   :  { %503 = vrot.lane.b32.xlu0 %v416_v42, %s1045_s0  ;;  %505 = vrot.lane.b32.xlu2 %v417_v2, %s1045_s0 }
 0x11d   :  { %v348_v9 = vpop.permute.xlu0 %347 }
 0x11e   :  { %v418_v36 = vadd.f32 %v348_v9, %v258_v32 }
 0x120   :  { %507 = vrot.lane.b32.xlu1 %v418_v36, %s1045_s0 }
 0x121   :  { %v352_v54 = vpop.permute.xlu1 %351 }
 0x122   :  { %v420_v61 = vadd.f32 %v352_v54, %v260_v33 }
 0x124   :  { %509 = vrot.lane.b32.xlu0 %v419_v11, %s1045_s0  ;;  %511 = vrot.lane.b32.xlu2 %v420_v61, %s1045_s0 }
 0x125   :  { %v354_v8 = vpop.permute.xlu0 %353 }
 0x126   :  { %v421_v15 = vadd.f32 %v354_v8, %v261_v35  ;;  %v458_v27 = vpop.permute.xlu2 %457 }
 0x127   :  { %554 = vst.msk [vmem:[%s2184_s3] sm:$0xff] %vm553_vm1, %v458_v27 }
 0x128   :  { %513 = vrot.lane.b32.xlu1 %v421_v15, %s1045_s0 }
 0x129   :  { %v358_v62 = vpop.permute.xlu1 %357 }
 0x12a   :  { %v423_v30 = vadd.f32 %v358_v62, %v263_v28 }
 0x12c   :  { %515 = vrot.lane.b32.xlu0 %v422_v18, %s1045_s0  ;;  %517 = vrot.lane.b32.xlu2 %v423_v30, %s1045_s0 }
 0x12d   :  { %v360_v60 = vpop.permute.xlu0 %359 }
 0x12e   :  { %v424_v3 = vadd.f32 %v360_v60, %v264_v22  ;;  %v464_v25 = vpop.permute.xlu2 %463 }
 0x12f   :  { %557 = vst.msk [vmem:[%s2184_s3 + $0x18] sm:$0xff] %vm553_vm1, %v464_v25 }
 0x130   :  { %519 = vrot.lane.b32.xlu1 %v424_v3, %s1045_s0 }
 0x134   :  { %587 = vperm.xlu0 %990, %v2219_v34   ;;  %591 = vperm.xlu2 %991, %v1235_v41  }
 0x138   :  { %595 = vperm.xlu1 %992, %v2220_v55  }
 0x13c   :  { %607 = vperm.xlu0 %990, %v1263_v45   ;;  %599 = vperm.xlu2 %991, %v2221_v56  }
 0x140   :  { %603 = vperm.xlu1 %992, %v1256_v44  }
 0x144   :  { %619 = vperm.xlu0 %990, %v1290_v51   ;;  %611 = vperm.xlu2 %991, %v1268_v46  }
 0x146   :  { %v470_v40 = vpop.permute.xlu2 %469 }
 0x147   :  { %560 = vst.msk [vmem:[%s2184_s3 + $0x30] sm:$0xff] %vm553_vm1, %v470_v40 }
 0x148   :  { %615 = vperm.xlu1 %992, %v1277_v47  }
 0x14c   :  { %631 = vperm.xlu0 %990, %v1317_v57   ;;  %623 = vperm.xlu2 %991, %v1295_v52  }
 0x14e   :  { %v476_v50 = vpop.permute.xlu2 %475 }
 0x14f   :  { %563 = vst.msk [vmem:[%s2184_s3 + $0x48] sm:$0xff] %vm553_vm1, %v476_v50 }
 0x150   :  { %627 = vperm.xlu1 %992, %v1304_v53  }
 0x152   :  { %v460_v20 = vpop.permute.xlu1 %459 }
 0x153   :  { %555 = vst.msk [vmem:[%s2184_s3 + $0x8] sm:$0xff] %vm553_vm1, %v460_v20 }
 0x154   :  { %643 = vperm.xlu0 %990, %v1344_v63   ;;  %635 = vperm.xlu2 %991, %v1322_v58  }
 0x156   :  { %v462_v29 = vpop.permute.xlu0 %461  ;;  %v482_v4 = vpop.permute.xlu2 %481 }
 0x157   :  { %556 = vst.msk [vmem:[%s2184_s3 + $0x10] sm:$0xff] %vm553_vm1, %v462_v29 }
 0x158   :  { %639 = vperm.xlu1 %992, %v1331_v59   ;;  %566 = vst.msk [vmem:[%s2184_s3 + $0x60] sm:$0xff] %vm553_vm1, %v482_v4 }
 0x15a   :  { %v466_v37 = vpop.permute.xlu1 %465 }
 0x15b   :  { %558 = vst.msk [vmem:[%s2184_s3 + $0x20] sm:$0xff] %vm553_vm1, %v466_v37 }
 0x15c   :  { %655 = vperm.xlu0 %990, %v1371_v5   ;;  %647 = vperm.xlu2 %991, %v1349_v0  }
 0x15e   :  { %v468_v42 = vpop.permute.xlu0 %467  ;;  %v488_v2 = vpop.permute.xlu2 %487 }
 0x15f   :  { %559 = vst.msk [vmem:[%s2184_s3 + $0x28] sm:$0xff] %vm553_vm1, %v468_v42 }
 0x160   :  { %651 = vperm.xlu1 %992, %v1358_v1   ;;  %569 = vst.msk [vmem:[%s2184_s3 + $0x78] sm:$0xff] %vm553_vm1, %v488_v2 }
 0x162   :  { %v472_v32 = vpop.permute.xlu1 %471 }
 0x163   :  { %561 = vst.msk [vmem:[%s2184_s3 + $0x38] sm:$0xff] %vm553_vm1, %v472_v32 }
 0x164   :  { %667 = vperm.xlu0 %990, %v1396_v10   ;;  %659 = vperm.xlu2 %991, %v1376_v6  }
 0x166   :  { %v474_v9 = vpop.permute.xlu0 %473  ;;  %v494_v48 = vpop.permute.xlu2 %493 }
 0x167   :  { %562 = vst.msk [vmem:[%s2184_s3 + $0x40] sm:$0xff] %vm553_vm1, %v474_v9  ;;  %v1885_v9 = vld [vmem:[%s2181_s1 + $0x2] ss:$0 sm:$0xff] }
 0x168   :  { %663 = vperm.xlu1 %992, %v1385_v7   ;;  %572 = vst.msk [vmem:[%s2184_s3 + $0x90] sm:$0xff] %vm553_vm1, %v494_v48 }
 0x16a   :  { %v478_v36 = vpop.permute.xlu1 %477 }
 0x16b   :  { %564 = vst.msk [vmem:[%s2184_s3 + $0x50] sm:$0xff] %vm553_vm1, %v478_v36 }
 0x16c   :  { %679 = vperm.xlu0 %990, %v1423_v16   ;;  %671 = vperm.xlu2 %991, %v1403_v12  }
 0x16e   :  { %v480_v26 = vpop.permute.xlu0 %479  ;;  %v500_v33 = vpop.permute.xlu2 %499 }
 0x16f   :  { %565 = vst.msk [vmem:[%s2184_s3 + $0x58] sm:$0xff] %vm553_vm1, %v480_v26 }
 0x170   :  { %675 = vperm.xlu1 %992, %v1412_v13   ;;  %575 = vst.msk [vmem:[%s2184_s3 + $0xa8] sm:$0xff] %vm553_vm1, %v500_v33 }
 0x172   :  { %v484_v54 = vpop.permute.xlu1 %483 }
 0x173   :  { %567 = vst.msk [vmem:[%s2184_s3 + $0x68] sm:$0xff] %vm553_vm1, %v484_v54 }
 0x174   :  { %691 = vperm.xlu0 %990, %v1448_v21   ;;  %683 = vperm.xlu2 %991, %v1428_v17  }
 0x176   :  { %v486_v11 = vpop.permute.xlu0 %485  ;;  %v506_v61 = vpop.permute.xlu2 %505 }
 0x177   :  { %568 = vst.msk [vmem:[%s2184_s3 + $0x70] sm:$0xff] %vm553_vm1, %v486_v11 }
 0x178   :  { %687 = vperm.xlu1 %992, %v1439_v19   ;;  %578 = vst.msk [vmem:[%s2184_s3 + $0xc0] sm:$0xff] %vm553_vm1, %v506_v61 }
 0x17a   :  { %v490_v35 = vpop.permute.xlu1 %489 }
 0x17b   :  { %570 = vst.msk [vmem:[%s2184_s3 + $0x80] sm:$0xff] %vm553_vm1, %v490_v35 }
 0x17c   :  { %703 = vperm.xlu0 %990, %v2214_v31   ;;  %695 = vperm.xlu2 %991, %v2212_v38  }
 0x17e   :  { %v492_v8 = vpop.permute.xlu0 %491  ;;  %v512_v15 = vpop.permute.xlu2 %511 }
 0x17f   :  { %571 = vst.msk [vmem:[%s2184_s3 + $0x88] sm:$0xff] %vm553_vm1, %v492_v8 }
 0x180   :  { %699 = vperm.xlu1 %992, %v2213_v49   ;;  %581 = vst.msk [vmem:[%s2184_s3 + $0xd8] sm:$0xff] %vm553_vm1, %v512_v15 }
 0x182   :  { %v496_v27 = vpop.permute.xlu1 %495 }
 0x183   :  { %573 = vst.msk [vmem:[%s2184_s3 + $0x98] sm:$0xff] %vm553_vm1, %v496_v27 }
 0x184   :  { %993 = vset.pattern.permute.xlu0 %v1047_v39  ;;  %707 = vperm.xlu2 %991, %v2216_v24  }
 0x185   :  { %747 = vperm.xlu0 %993, %v2219_v34  }
 0x186   :  { %v498_v23 = vpop.permute.xlu0 %497  ;;  %v518_v28 = vpop.permute.xlu2 %517 }
 0x187   :  { %574 = vst.msk [vmem:[%s2184_s3 + $0xa0] sm:$0xff] %vm553_vm1, %v498_v23 }
 0x188   :  { %711 = vperm.xlu1 %992, %v2217_v43   ;;  %584 = vst.msk [vmem:[%s2184_s3 + $0xf0] sm:$0xff] %vm553_vm1, %v518_v28 }
 0x18a   :  { %v502_v62 = vpop.permute.xlu1 %501 }
 0x18b   :  { %576 = vst.msk [vmem:[%s2184_s3 + $0xb0] sm:$0xff] %vm553_vm1, %v502_v62 }
 0x18c   :  { %994 = vset.pattern.permute.xlu2 %v1047_v39 }
 0x18d   :  { %767 = vperm.xlu0 %993, %v1263_v45   ;;  %751 = vperm.xlu2 %994, %v1235_v41  }
 0x18e   :  { %v504_v18 = vpop.permute.xlu0 %503  ;;  %v1748_v30 = vpop.permute.xlu2 %591 }
 0x18f   :  { %577 = vst.msk [vmem:[%s2184_s3 + $0xb8] sm:$0xff] %vm553_vm1, %v504_v18 }
 0x190   :  { %995 = vset.pattern.permute.xlu1 %v1047_v39  ;;  %v1905_v39 = vld [vmem:[%s2181_s1 + $0x4] ss:$0 sm:$0xff] }
 0x191   :  { %755 = vperm.xlu1 %995, %v2220_v55  }
 0x192   :  { %v508_v14 = vpop.permute.xlu1 %507 }
 0x193   :  { %579 = vst.msk [vmem:[%s2184_s3 + $0xc8] sm:$0xff] %vm553_vm1, %v508_v14 }
 0x195   :  { %779 = vperm.xlu0 %993, %v1290_v51   ;;  %759 = vperm.xlu2 %994, %v2221_v56  }
 0x196   :  { %v510_v41 = vpop.permute.xlu0 %509  ;;  %v1761_v45 = vpop.permute.xlu2 %599 }
 0x197   :  { %580 = vst.msk [vmem:[%s2184_s3 + $0xd0] sm:$0xff] %vm553_vm1, %v510_v41 }
 0x199   :  { %763 = vperm.xlu1 %995, %v1256_v44  }
 0x19a   :  { %v514_v22 = vpop.permute.xlu1 %513 }
 0x19b   :  { %582 = vst.msk [vmem:[%s2184_s3 + $0xe0] sm:$0xff] %vm553_vm1, %v514_v22 }
 0x19d   :  { %791 = vperm.xlu0 %993, %v1317_v57   ;;  %771 = vperm.xlu2 %994, %v1268_v46  }
 0x19e   :  { %v516_v51 = vpop.permute.xlu0 %515  ;;  %v1774_v60 = vpop.permute.xlu2 %611 }
 0x19f   :  { %583 = vst.msk [vmem:[%s2184_s3 + $0xe8] sm:$0xff] %vm553_vm1, %v516_v51 }
 0x1a1   :  { %775 = vperm.xlu1 %995, %v1277_v47  }
 0x1a2   :  { %v520_v44 = vpop.permute.xlu1 %519 }
 0x1a3   :  { %585 = vst.msk [vmem:[%s2184_s3 + $0xf8] sm:$0xff] %vm553_vm1, %v520_v44 }
 0x1a5   :  { %803 = vperm.xlu0 %993, %v1344_v63   ;;  %783 = vperm.xlu2 %994, %v1295_v52  }
 0x1a6   :  { %v1787_v46 = vpop.permute.xlu0 %587  ;;  %v1789_v57 = vpop.permute.xlu2 %623 }
 0x1a9   :  { %787 = vperm.xlu1 %995, %v1304_v53  }
 0x1aa   :  { %v1792_v3 = vpop.permute.xlu1 %595 }
 0x1ad   :  { %815 = vperm.xlu0 %993, %v1371_v5   ;;  %795 = vperm.xlu2 %994, %v1322_v58  }
 0x1ae   :  { %v1796_v47 = vpop.permute.xlu0 %607  ;;  %v1798_v25 = vpop.permute.xlu2 %635 }
 0x1b1   :  { %799 = vperm.xlu1 %995, %v1331_v59  }
 0x1b2   :  { %v1801_v63 = vpop.permute.xlu1 %603 }
 0x1b5   :  { %827 = vperm.xlu0 %993, %v1396_v10   ;;  %807 = vperm.xlu2 %994, %v1349_v0  }
 0x1b6   :  { %v1805_v52 = vpop.permute.xlu0 %619  ;;  %v1807_v53 = vpop.permute.xlu2 %647 }
 0x1b9   :  { %811 = vperm.xlu1 %995, %v1358_v1  }
 0x1ba   :  { %v1810_v5 = vpop.permute.xlu1 %615 }
 0x1bd   :  { %839 = vperm.xlu0 %993, %v1423_v16   ;;  %819 = vperm.xlu2 %994, %v1376_v6  }
 0x1be   :  { %v1814_v58 = vpop.permute.xlu0 %631  ;;  %v1816_v59 = vpop.permute.xlu2 %659 }
 0x1c1   :  { %823 = vperm.xlu1 %995, %v1385_v7  }
 0x1c2   :  { %v1819_v10 = vpop.permute.xlu1 %627 }
 0x1c5   :  { %851 = vperm.xlu0 %993, %v1448_v21   ;;  %831 = vperm.xlu2 %994, %v1403_v12  }
 0x1c6   :  { %v1823_v0 = vpop.permute.xlu0 %643  ;;  %v1825_v1 = vpop.permute.xlu2 %671 }
 0x1c9   :  { %835 = vperm.xlu1 %995, %v1412_v13  }
 0x1ca   :  { %v1828_v16 = vpop.permute.xlu1 %639 }
 0x1cd   :  { %863 = vperm.xlu0 %993, %v2214_v31   ;;  %843 = vperm.xlu2 %994, %v1428_v17  }
 0x1ce   :  { %v1832_v6 = vpop.permute.xlu0 %655  ;;  %v1834_v7 = vpop.permute.xlu2 %683 }
 0x1d1   :  { %847 = vperm.xlu1 %995, %v1439_v19  }
 0x1d2   :  { %v1837_v21 = vpop.permute.xlu1 %651 }
 0x1d5   :  { %855 = vperm.xlu2 %994, %v2212_v38   ;;  %v1004_v38 = vld [vmem:[%s2181_s1] ss:$0 sm:$0xff] }
 0x1d6   :  { %v1840_v12 = vpop.permute.xlu0 %667  ;;  %v1842_v34 = vpop.permute.xlu2 %695 }
 0x1d9   :  { %859 = vperm.xlu1 %995, %v2213_v49   ;;  %v1012_v49 = vld [vmem:[%s2182_s2 + $0x8] sm:$0xff] }
 0x1da   :  { %v1845_v13 = vpop.permute.xlu1 %663 }
 0x1dd   :  { %867 = vperm.xlu2 %994, %v2216_v24   ;;  %v715_v24 = vmul.f32 %v1012_v49, %v1748_v30 }
 0x1de   :  { %v1848_v17 = vpop.permute.xlu0 %679  ;;  %v1850_v31 = vpop.permute.xlu2 %707 }
 0x1e1   :  { %871 = vperm.xlu1 %995, %v2217_v43  }
 0x1e2   :  { %v1853_v19 = vpop.permute.xlu1 %675 }
 0x1e6   :  { %v1858_v55 = vpop.permute.xlu0 %691 }
 0x1e7   :  { %v752_v56 = vpop.permute.xlu2 %751 }
 0x1e8   :  { %v883_v40 = vmul.f32 %v1004_v38, %v752_v56 }
 0x1ea   :  { %v1864_v50 = vpop.permute.xlu1 %687  ;;  %v915_v20 = vadd.f32 %v883_v40, %v715_v24 }
 0x1ec   :  { %947 = vst.msk [vmem:[%s2185_s4 + $0x8] sm:$0xff] %vm136_vm0, %v915_v20 }
 0x1ee   :  { %v1870_v43 = vpop.permute.xlu0 %703 }
 0x1ef   :  { %v760_v29 = vpop.permute.xlu2 %759 }
 0x1f0   :  { %v885_v42 = vmul.f32 %v1004_v38, %v760_v29 }
 0x1f2   :  { %v1876_v2 = vpop.permute.xlu1 %699 }
 0x1f3   :  { %v1013_v4 = vld [vmem:[%s2182_s2 + $0x18] sm:$0xff] }
 0x1f4   :  { %v717_v37 = vmul.f32 %v1013_v4, %v1761_v45 }
 0x1f6   :  { %v917_v32 = vadd.f32 %v885_v42, %v717_v37 }
 0x1f7   :  { %v748_v48 = vpop.permute.xlu0 %747  ;;  %v772_v36 = vpop.permute.xlu2 %771 }
 0x1f8   :  { %949 = vst.msk [vmem:[%s2185_s4 + $0x18] sm:$0xff] %vm136_vm0, %v917_v32  ;;  %v882_v61 = vmul.f32 %v1004_v38, %v748_v48  ;;  %v888_v35 = vmul.f32 %v1885_v9, %v772_v36 }
 0x1fa   :  { %v1896_v8 = vpop.permute.xlu1 %711 }
 0x1ff   :  { %v1014_v26 = vld [vmem:[%s2182_s2 + $0x30] sm:$0xff]  ;;  %v1015_v54 = vld [vmem:[%s2182_s2] sm:$0xff]  ;;  %v768_v23 = vpop.permute.xlu0 %767  ;;  %v784_v28 = vpop.permute.xlu2 %783 }
 0x200   :  { %v720_v33 = vmul.f32 %v1014_v26, %v1774_v60  ;;  %v714_v11 = vmul.f32 %v1015_v54, %v1787_v46  ;;  %v887_v41 = vmul.f32 %v1885_v9, %v768_v23  ;;  %v891_v45 = vmul.f32 %v1905_v39, %v784_v28 }
 0x202   :  { %v914_v15 = vadd.f32 %v882_v61, %v714_v11  ;;  %v920_v27 = vadd.f32 %v888_v35, %v720_v33 }
 0x203   :  { %v756_v60 = vpop.permute.xlu1 %755 }
 0x204   :  { %946 = vst.msk [vmem:[%s2185_s4] sm:$0xff] %vm136_vm0, %v914_v15 }
 0x205   :  { %952 = vst.msk [vmem:[%s2185_s4 + $0x30] sm:$0xff] %vm136_vm0, %v920_v27 }
 0x20b   :  { %v764_v32 = vpop.permute.xlu1 %763 }
 0x20c   :  { %v1016_v62 = vld [vmem:[%s2182_s2 + $0x48] sm:$0xff]  ;;  %v1018_v44 = vld [vmem:[%s2182_s2 + $0x10] sm:$0xff] }
 0x20d   :  { %v723_v18 = vmul.f32 %v1016_v62, %v1789_v57  ;;  %v1017_v30 = vld [vmem:[%s2182_s2 + $0x28] sm:$0xff]  ;;  %v716_v46 = vmul.f32 %v1018_v44, %v1792_v3  ;;  %v884_v57 = vmul.f32 %v1004_v38, %v756_v60  ;;  %v780_v3 = vpop.permute.xlu0 %779  ;;  %v796_v38 = vpop.permute.xlu2 %795 }
 0x20e   :  { %v719_v14 = vmul.f32 %v1017_v30, %v1796_v47  ;;  %v1932_v47 = vld [vmem:[%s2181_s1 + $0x6] ss:$0 sm:$0xff]  ;;  %v890_v29 = vmul.f32 %v1905_v39, %v780_v3 }
 0x20f   :  { %v923_v51 = vadd.f32 %v891_v45, %v723_v18  ;;  %v916_v56 = vadd.f32 %v884_v57, %v716_v46  ;;  %v894_v4 = vmul.f32 %v1932_v47, %v796_v38 }
 0x210   :  { %v919_v22 = vadd.f32 %v887_v41, %v719_v14 }
 0x211   :  { %955 = vst.msk [vmem:[%s2185_s4 + $0x48] sm:$0xff] %vm136_vm0, %v923_v51 }
 0x212   :  { %951 = vst.msk [vmem:[%s2185_s4 + $0x28] sm:$0xff] %vm136_vm0, %v919_v22 }
 0x213   :  { %948 = vst.msk [vmem:[%s2185_s4 + $0x10] sm:$0xff] %vm136_vm0, %v916_v56  ;;  %v776_v28 = vpop.permute.xlu1 %775 }
 0x215   :  { %v792_v26 = vpop.permute.xlu0 %791 }
 0x216   :  { %v893_v35 = vmul.f32 %v1905_v39, %v792_v26 }
 0x21a   :  { %v1019_v49 = vld [vmem:[%s2182_s2 + $0x60] sm:$0xff] }
 0x21b   :  { %v726_v24 = vmul.f32 %v1019_v49, %v1798_v25  ;;  %v1020_v40 = vld [vmem:[%s2182_s2 + $0x40] sm:$0xff]  ;;  %v886_v25 = vmul.f32 %v1885_v9, %v764_v32  ;;  %v788_v57 = vpop.permute.xlu1 %787 }
 0x21c   :  { %v722_v20 = vmul.f32 %v1020_v40, %v1805_v52  ;;  %v1021_v48 = vld [vmem:[%s2182_s2 + $0x20] sm:$0xff] }
 0x21d   :  { %v926_v42 = vadd.f32 %v894_v4, %v726_v24  ;;  %v718_v36 = vmul.f32 %v1021_v48, %v1801_v63  ;;  %v808_v63 = vpop.permute.xlu2 %807 }
 0x21e   :  { %v922_v37 = vadd.f32 %v890_v29, %v722_v20  ;;  %v897_v15 = vmul.f32 %v1932_v47, %v808_v63 }
 0x21f   :  { %958 = vst.msk [vmem:[%s2185_s4 + $0x60] sm:$0xff] %vm136_vm0, %v926_v42  ;;  %v918_v52 = vadd.f32 %v886_v25, %v718_v36 }
 0x220   :  { %954 = vst.msk [vmem:[%s2185_s4 + $0x40] sm:$0xff] %vm136_vm0, %v922_v37 }
 0x221   :  { %950 = vst.msk [vmem:[%s2185_s4 + $0x20] sm:$0xff] %vm136_vm0, %v918_v52 }
 0x223   :  { %v800_v32 = vpop.permute.xlu1 %799 }
 0x228   :  { %v1022_v33 = vld [vmem:[%s2182_s2 + $0x78] sm:$0xff] }
 0x229   :  { %v729_v54 = vmul.f32 %v1022_v33, %v1807_v53  ;;  %v1023_v11 = vld [vmem:[%s2182_s2 + $0x58] sm:$0xff]  ;;  %v889_v53 = vmul.f32 %v1885_v9, %v776_v28  ;;  %v820_v9 = vpop.permute.xlu2 %819 }
 0x22a   :  { %v725_v61 = vmul.f32 %v1023_v11, %v1814_v58  ;;  %v1024_v62 = vld [vmem:[%s2182_s2 + $0x38] sm:$0xff]  ;;  %v1991_v58 = vld [vmem:[%s2181_s1 + $0x8] ss:$0 sm:$0xff] }
 0x22b   :  { %v929_v23 = vadd.f32 %v897_v15, %v729_v54  ;;  %v721_v18 = vmul.f32 %v1024_v62, %v1810_v5  ;;  %v804_v5 = vpop.permute.xlu0 %803  ;;  %v900_v60 = vmul.f32 %v1991_v58, %v820_v9  ;;  %v812_v15 = vpop.permute.xlu1 %811 }
 0x22c   :  { %v925_v27 = vadd.f32 %v893_v35, %v725_v61  ;;  %v896_v51 = vmul.f32 %v1932_v47, %v804_v5 }
 0x22d   :  { %961 = vst.msk [vmem:[%s2185_s4 + $0x78] sm:$0xff] %vm136_vm0, %v929_v23  ;;  %v921_v30 = vadd.f32 %v889_v53, %v721_v18 }
 0x22e   :  { %957 = vst.msk [vmem:[%s2185_s4 + $0x58] sm:$0xff] %vm136_vm0, %v925_v27 }
 0x22f   :  { %953 = vst.msk [vmem:[%s2185_s4 + $0x38] sm:$0xff] %vm136_vm0, %v921_v30 }
 0x236   :  { %v1025_v14 = vld [vmem:[%s2182_s2 + $0x90] sm:$0xff] }
 0x237   :  { %v732_v41 = vmul.f32 %v1025_v14, %v1816_v59  ;;  %v1026_v45 = vld [vmem:[%s2182_s2 + $0x70] sm:$0xff]  ;;  %v892_v59 = vmul.f32 %v1905_v39, %v788_v57  ;;  %v832_v39 = vpop.permute.xlu2 %831 }
 0x238   :  { %v728_v22 = vmul.f32 %v1026_v45, %v1823_v0  ;;  %v1027_v56 = vld [vmem:[%s2182_s2 + $0x50] sm:$0xff]  ;;  %v2023_v0 = vld [vmem:[%s2181_s1 + $0xa] ss:$0 sm:$0xff]  ;;  %v824_v45 = vpop.permute.xlu1 %823 }
 0x239   :  { %v932_v46 = vadd.f32 %v900_v60, %v732_v41  ;;  %v724_v3 = vmul.f32 %v1027_v56, %v1819_v10  ;;  %v816_v10 = vpop.permute.xlu0 %815  ;;  %v903_v4 = vmul.f32 %v2023_v0, %v832_v39 }
 0x23a   :  { %v928_v44 = vadd.f32 %v896_v51, %v728_v22  ;;  %v899_v29 = vmul.f32 %v1991_v58, %v816_v10 }
 0x23b   :  { %964 = vst.msk [vmem:[%s2185_s4 + $0x90] sm:$0xff] %vm136_vm0, %v932_v46  ;;  %v924_v38 = vadd.f32 %v892_v59, %v724_v3 }
 0x23c   :  { %960 = vst.msk [vmem:[%s2185_s4 + $0x70] sm:$0xff] %vm136_vm0, %v928_v44 }
 0x23d   :  { %956 = vst.msk [vmem:[%s2185_s4 + $0x50] sm:$0xff] %vm136_vm0, %v924_v38 }
 0x240   :  { %v836_v39 = vpop.permute.xlu1 %835 }
 0x244   :  { %v1028_v49 = vld [vmem:[%s2182_s2 + $0xa8] sm:$0xff] }
 0x245   :  { %v735_v24 = vmul.f32 %v1028_v49, %v1825_v1  ;;  %v1029_v40 = vld [vmem:[%s2182_s2 + $0x88] sm:$0xff]  ;;  %v895_v1 = vmul.f32 %v1932_v47, %v800_v32  ;;  %v844_v47 = vpop.permute.xlu2 %843 }
 0x246   :  { %v731_v20 = vmul.f32 %v1029_v40, %v1832_v6  ;;  %v1030_v48 = vld [vmem:[%s2182_s2 + $0x68] sm:$0xff] }
 0x247   :  { %v935_v42 = vadd.f32 %v903_v4, %v735_v24  ;;  %v727_v36 = vmul.f32 %v1030_v48, %v1828_v16  ;;  %v2055_v6 = vld [vmem:[%s2181_s1 + $0xc] ss:$0 sm:$0xff]  ;;  %v828_v16 = vpop.permute.xlu0 %827 }
 0x248   :  { %v931_v37 = vadd.f32 %v899_v29, %v731_v20  ;;  %v902_v54 = vmul.f32 %v2023_v0, %v828_v16  ;;  %v906_v11 = vmul.f32 %v2055_v6, %v844_v47  ;;  %v848_v4 = vpop.permute.xlu1 %847 }
 0x249   :  { %967 = vst.msk [vmem:[%s2185_s4 + $0xa8] sm:$0xff] %vm136_vm0, %v935_v42  ;;  %v927_v25 = vadd.f32 %v895_v1, %v727_v36  ;;  %v907_v32 = vmul.f32 %v2055_v6, %v848_v4 }
 0x24a   :  { %963 = vst.msk [vmem:[%s2185_s4 + $0x88] sm:$0xff] %vm136_vm0, %v931_v37 }
 0x24b   :  { %959 = vst.msk [vmem:[%s2185_s4 + $0x68] sm:$0xff] %vm136_vm0, %v927_v25 }
 0x24f   :  { %v840_v28 = vpop.permute.xlu0 %839 }
 0x250   :  { %v905_v5 = vmul.f32 %v2023_v0, %v840_v28 }
 0x252   :  { %v1031_v52 = vld [vmem:[%s2182_s2 + $0xc0] sm:$0xff] }
 0x253   :  { %v738_v26 = vmul.f32 %v1031_v52, %v1834_v7  ;;  %v1032_v63 = vld [vmem:[%s2182_s2 + $0xa0] sm:$0xff]  ;;  %v898_v7 = vmul.f32 %v1991_v58, %v812_v15 }
 0x254   :  { %v734_v33 = vmul.f32 %v1032_v63, %v1840_v12  ;;  %v1033_v27 = vld [vmem:[%s2182_s2 + $0x80] sm:$0xff] }
 0x255   :  { %v938_v35 = vadd.f32 %v906_v11, %v738_v26  ;;  %v730_v23 = vmul.f32 %v1033_v27, %v1837_v21  ;;  %v856_v21 = vpop.permute.xlu2 %855 }
 0x256   :  { %v934_v61 = vadd.f32 %v902_v54, %v734_v33  ;;  %v909_v9 = vmul.f32 %v2055_v6, %v856_v21 }
 0x257   :  { %970 = vst.msk [vmem:[%s2185_s4 + $0xc0] sm:$0xff] %vm136_vm0, %v938_v35  ;;  %v930_v12 = vadd.f32 %v898_v7, %v730_v23 }
 0x258   :  { %966 = vst.msk [vmem:[%s2185_s4 + $0xa0] sm:$0xff] %vm136_vm0, %v934_v61 }
 0x259   :  { %962 = vst.msk [vmem:[%s2185_s4 + $0x80] sm:$0xff] %vm136_vm0, %v930_v12 }
 0x260   :  { %v1034_v62 = vld [vmem:[%s2182_s2 + $0xd8] sm:$0xff] }
 0x261   :  { %v741_v18 = vmul.f32 %v1034_v62, %v1842_v34  ;;  %v1035_v53 = vld [vmem:[%s2182_s2 + $0xb8] sm:$0xff]  ;;  %v901_v34 = vmul.f32 %v1991_v58, %v824_v45  ;;  %v868_v58 = vpop.permute.xlu2 %867 }
 0x262   :  { %v737_v30 = vmul.f32 %v1035_v53, %v1848_v17  ;;  %v1036_v22 = vld [vmem:[%s2182_s2 + $0x98] sm:$0xff]  ;;  %v1011_v17 = vld [vmem:[%s2181_s1 + $0xe] ss:$0 sm:$0xff] }
 0x263   :  { %v941_v41 = vadd.f32 %v909_v9, %v741_v18  ;;  %v733_v51 = vmul.f32 %v1036_v22, %v1845_v13  ;;  %v852_v13 = vpop.permute.xlu0 %851  ;;  %v912_v59 = vmul.f32 %v1011_v17, %v868_v58 }
 0x264   :  { %v937_v14 = vadd.f32 %v905_v5, %v737_v30  ;;  %v908_v3 = vmul.f32 %v2055_v6, %v852_v13 }
 0x265   :  { %973 = vst.msk [vmem:[%s2185_s4 + $0xd8] sm:$0xff] %vm136_vm0, %v941_v41  ;;  %v933_v60 = vadd.f32 %v901_v34, %v733_v51 }
 0x266   :  { %969 = vst.msk [vmem:[%s2185_s4 + $0xb8] sm:$0xff] %vm136_vm0, %v937_v14 }
 0x267   :  { %965 = vst.msk [vmem:[%s2185_s4 + $0x98] sm:$0xff] %vm136_vm0, %v933_v60 }
 0x26b   :  { %v864_v40 = vpop.permute.xlu0 %863 }
 0x26c   :  { %v911_v20 = vmul.f32 %v1011_v17, %v864_v40 }
 0x26e   :  { %v1037_v44 = vld [vmem:[%s2182_s2 + $0xf0] sm:$0xff] }
 0x26f   :  { %v744_v46 = vmul.f32 %v1037_v44, %v1850_v31  ;;  %v1038_v57 = vld [vmem:[%s2182_s2 + $0xd0] sm:$0xff]  ;;  %v904_v31 = vmul.f32 %v2023_v0, %v836_v39 }
 0x270   :  { %v740_v56 = vmul.f32 %v1038_v57, %v1858_v55  ;;  %v1039_v49 = vld [vmem:[%s2182_s2 + $0xb0] sm:$0xff] }
 0x271   :  { %v944_v10 = vadd.f32 %v912_v59, %v744_v46  ;;  %v736_v24 = vmul.f32 %v1039_v49, %v1853_v19 }
 0x272   :  { %v940_v38 = vadd.f32 %v908_v3, %v740_v56 }
 0x273   :  { %976 = vst.msk [vmem:[%s2185_s4 + $0xf0] sm:$0xff] %vm136_vm0, %v944_v10  ;;  %v936_v55 = vadd.f32 %v904_v31, %v736_v24 }
 0x274   :  { %972 = vst.msk [vmem:[%s2185_s4 + $0xd0] sm:$0xff] %vm136_vm0, %v940_v38 }
 0x275   :  { %968 = vst.msk [vmem:[%s2185_s4 + $0xb0] sm:$0xff] %vm136_vm0, %v936_v55 }
 0x27c   :  { %v1040_v19 = vld [vmem:[%s2182_s2 + $0xe8] sm:$0xff] }
 0x27d   :  { %v743_v0 = vmul.f32 %v1040_v19, %v1870_v43  ;;  %v1041_v37 = vld [vmem:[%s2182_s2 + $0xc8] sm:$0xff]  ;;  %v860_v43 = vpop.permute.xlu1 %859 }
 0x27e   :  { %v739_v42 = vmul.f32 %v1041_v37, %v1864_v50  ;;  %v910_v1 = vmul.f32 %v1011_v17, %v860_v43 }
 0x27f   :  { %v943_v29 = vadd.f32 %v911_v20, %v743_v0 }
 0x280   :  { %v939_v48 = vadd.f32 %v907_v32, %v739_v42 }
 0x281   :  { %975 = vst.msk [vmem:[%s2185_s4 + $0xe8] sm:$0xff] %vm136_vm0, %v943_v29 }
 0x282   :  { %971 = vst.msk [vmem:[%s2185_s4 + $0xc8] sm:$0xff] %vm136_vm0, %v939_v48 }
 0x285   :  { %v872_v25 = vpop.permute.xlu1 %871 }
 0x286   :  { %v913_v52 = vmul.f32 %v1011_v17, %v872_v25 }
 0x289   :  { %v1042_v36 = vld [vmem:[%s2182_s2 + $0xe0] sm:$0xff] }
 0x28a   :  { %v742_v50 = vmul.f32 %v1042_v36, %v1876_v2 }
 0x28c   :  { %v942_v6 = vadd.f32 %v910_v1, %v742_v50 }
 0x28e   :  { %974 = vst.msk [vmem:[%s2185_s4 + $0xe0] sm:$0xff] %vm136_vm0, %v942_v6 }
 0x295   :  { %v1043_v16 = vld [vmem:[%s2182_s2 + $0xf8] sm:$0xff] }
 0x296   :  { %v745_v47 = vmul.f32 %v1043_v16, %v1896_v8 }
 0x298   :  { %v945_v26 = vadd.f32 %v913_v52, %v745_v47 }
 0x29a   :  { %977 = vst.msk [vmem:[%s2185_s4 + $0xf8] sm:$0xff] %vm136_vm0, %v945_v26 }

</bundles_post_ra>
